<compile_context>
chip_gen: v7x
topology: tpu7x:2x2x1
jax: 0.10.0
libtpu: 0.0.40
codegen_flags: <defaults>
</compile_context>

<pallas_src>
import functools

import jax
import jax.numpy as jnp
from jax.experimental import pallas as pl
from jax.experimental.pallas import tpu as pltpu


def _intensity_net_kernel(x_ref, w1_ref, b1_ref, w2_ref, b2_ref, wh_ref, bh_ref,
                          out_ref, *scratch, num_channels, lane_rows):
    """One row-tile of the IntensityNet forward pass.

    x_ref:  (TM, input_size) in the input dtype (cast to compute dtype in-kernel)
    w*_ref: resident weights (compute dtype), biases f32
    out_ref: (TM*C//128, 128) f32 lane-dense slab   if lane_rows is not None
             (TM, C)          f32                    otherwise
    scratch: [ (TM, C) f32 VMEM ] only for the lane-dense path.
    """
    cd = w1_ref.dtype
    C = num_channels

    # In-kernel cast: x streams from HBM in its original dtype; the cast rides
    # VPU slack (kernel is MXU-cadence bound, not HBM bound).
    x = x_ref[...].astype(cd)

    # ---- preprocessing_net: (Linear -> ReLU -> Dropout[eval=identity]) x 2
    h = jnp.dot(x, w1_ref[...], preferred_element_type=jnp.float32) + b1_ref[...]
    h = jnp.maximum(h, 0.0).astype(cd)
    h = jnp.dot(h, w2_ref[...], preferred_element_type=jnp.float32) + b2_ref[...]
    h = jnp.maximum(h, 0.0).astype(cd)

    # ---- fused heads: columns [0:C] = mark_net, column [C] = intensity_net
    head = jnp.dot(h, wh_ref[...], preferred_element_type=jnp.float32) + bh_ref[...]
    mark = head[:, :C]
    log_intensity = head[:, C:C + 1]

    # ---- log_softmax over channels (f32, max-stabilized)
    m = jnp.max(mark, axis=-1, keepdims=True)
    z = mark - m
    lse = jnp.log(jnp.sum(jnp.exp(z), axis=-1, keepdims=True))
    result = (z - lse) + log_intensity               # (TM, C) f32

    if lane_rows is None:
        out_ref[...] = result                        # plain (TM, C) store
    else:
        # Lane-dense relayout: out[R, lane_rows_cols] packs `lane_rows` consecutive
        # x-rows per 128-lane output row, in exact row-major flattening order:
        #   out[R, C*j + c] == result[lane_rows*R + j, c]
        # Implemented with a VMEM scratch + sublane-strided reads (piece j = rows
        # j, j+lane_rows, ...) concatenated along lanes -> one dense store.
        res = scratch[0]
        res[...] = result
        n_out = out_ref.shape[0]                     # TM // lane_rows
        pieces = [res[pl.ds(j, n_out, stride=lane_rows), :] for j in range(lane_rows)]
        out_ref[...] = jnp.concatenate(pieces, axis=-1)


def prepare_params(params, compute_dtype=jnp.bfloat16):
    """One-time weight preparation (hoisted out of the hot forward path).

    Fuses the mark head (H, C) and intensity head (H, 1) into a single (H, C+1)
    matmul with a fused (1, C+1) f32 bias, and casts weights to the compute dtype.
    """
    cd = jnp.dtype(compute_dtype)
    return {
        "w1": params["w1"].astype(cd),
        "b1": params["b1"].astype(jnp.float32),
        "w2": params["w2"].astype(cd),
        "b2": params["b2"].astype(jnp.float32),
        "w_head": jnp.concatenate([params["wm"], params["wi"]], axis=1).astype(cd),
        "b_head": jnp.concatenate([params["bm"], params["bi"]], axis=1).astype(jnp.float32),
    }


def _forward_impl(x, prepared, *, tile_m, lane_dense):
    M, input_size = x.shape
    w1, b1 = prepared["w1"], prepared["b1"]
    w2, b2 = prepared["w2"], prepared["b2"]
    wh, bh = prepared["w_head"], prepared["b_head"]
    H = w1.shape[1]
    C = wh.shape[1] - 1
    cd = w1.dtype

    # Lane-dense output only when C packs evenly into the 128-lane vreg width.
    lane_rows = (128 // C) if (lane_dense and 0 < C <= 128 and 128 % C == 0) else None

    # Row-tile alignment unit:
    #  - plain path: 8 rows (f32 sublane alignment for x block and (TM, C) out block)
    #  - lane-dense: 8 * lane_rows rows so the (TM*C//128, 128) out block has a
    #    sublane extent that is a multiple of 8.
    unit = 8 * lane_rows if lane_rows is not None else 8

    units = pl.cdiv(M, unit)
    tile_units = max(1, tile_m // unit)
    tile_units = min(tile_units, units)
    if units >= 2:
        # Guarantee >= 2 grid steps so both v7x TensorCores get work
        # (harmless on v5e/v6e: one extra cheap grid step at most).
        tile_units = min(tile_units, max(1, units // 2))
    tile_m = tile_units * unit
    grid_m = pl.cdiv(M, tile_m)
    m_pad = grid_m * tile_m

    x_in = x
    if m_pad != M:
        # TODO(synk): replace this wrapper-side zero pad (one extra pass over x when
        # M % tile_m != 0) with in-pipeline ragged-tail handling; padded rows produce
        # finite garbage that is sliced off below, so correctness is unaffected.
        x_in = jnp.pad(x, ((0, m_pad - M), (0, 0)))

    if lane_rows is not None:
        n_out = tile_m * C // 128
        out_shape = jax.ShapeDtypeStruct((m_pad * C // 128, 128), jnp.float32)
        out_spec = pl.BlockSpec((n_out, 128), lambda i: (i, 0))
        scratch_shapes = [pltpu.VMEM((tile_m, C), jnp.float32)]
    else:
        out_shape = jax.ShapeDtypeStruct((m_pad, C), jnp.float32)
        out_spec = pl.BlockSpec((tile_m, C), lambda i: (i, 0))
        scratch_shapes = []

    def full(a):
        return pl.BlockSpec(a.shape, lambda i: (0, 0))

    flops = 2 * m_pad * (input_size * H + H * H + H * (C + 1))
    bytes_accessed = (
        m_pad * input_size * x.dtype.itemsize            # x stream (original dtype)
        + m_pad * C * 4                                   # all_log output
        + (w1.size + w2.size + wh.size) * cd.itemsize     # weights (resident)
        + (b1.size + b2.size + bh.size) * 4               # biases
    )
    cost = pl.CostEstimate(flops=flops,
                           transcendentals=m_pad * (C + 1),
                           bytes_accessed=bytes_accessed)

    kernel = functools.partial(_intensity_net_kernel,
                               num_channels=C, lane_rows=lane_rows)

    out = pl.pallas_call(
        kernel,
        out_shape=out_shape,
        grid_spec=pltpu.PrefetchScalarGridSpec(
            num_scalar_prefetch=0,
            grid=(grid_m,),
            in_specs=[
                pl.BlockSpec((tile_m, input_size), lambda i: (i, 0)),
                full(w1), full(b1),
                full(w2), full(b2),
                full(wh), full(bh),
            ],
            out_specs=out_spec,
            scratch_shapes=scratch_shapes,
        ),
        compiler_params=pltpu.CompilerParams(
            dimension_semantics=("parallel",),
        ),
        cost_estimate=cost,
    )(x_in, w1, b1, w2, b2, wh, bh)

    if lane_rows is not None:
        # Row-major flattening is identical -> this reshape is free (metadata only).
        all_log = out.reshape(m_pad, C)[:M]
    else:
        all_log = out[:M]

    # total_intensity = exp(log_intensity); logsumexp(log_softmax) == 0, so the value
    # is recoverable from the lane-dense f32 output without a (M, 1) kernel store.
    total = jnp.exp(jax.scipy.special.logsumexp(all_log, axis=-1))
    return {"all_log_mark_intensities": all_log, "total_intensity": total}


def intensity_net_forward(x, prepared, *, tile_m=4096, lane_dense=True):
    """x: (M, input_size). prepared: output of prepare_params()."""
    try:
        return _forward_impl(x, prepared, tile_m=tile_m, lane_dense=lane_dense)
    except Exception:
        if not lane_dense:
            raise
        # Fallback: plain (M, C) output path (masked stores) if the lane-dense
        # relayout variant fails to lower on this Mosaic version.
        return _forward_impl(x, prepared, tile_m=tile_m, lane_dense=False)


def init_params(key, input_size, hidden_size, num_channels):
    """Deterministic synthetic parameters (Linear weights stored as [in, out])."""
    ks = jax.random.split(key, 8)
    scale = 0.1
    return {
        "w1": scale * jax.random.normal(ks[0], (input_size, hidden_size), jnp.float32),
        "b1": scale * jax.random.normal(ks[1], (1, hidden_size), jnp.float32),
        "w2": scale * jax.random.normal(ks[2], (hidden_size, hidden_size), jnp.float32),
        "b2": scale * jax.random.normal(ks[3], (1, hidden_size), jnp.float32),
        "wm": scale * jax.random.normal(ks[4], (hidden_size, num_channels), jnp.float32),
        "bm": scale * jax.random.normal(ks[5], (1, num_channels), jnp.float32),
        "wi": scale * jax.random.normal(ks[6], (hidden_size, 1), jnp.float32),
        "bi": scale * jax.random.normal(ks[7], (1, 1), jnp.float32),
    }


def reference_forward(x, params, *, compute_dtype=jnp.float32):
    """Pure-JAX reference mirroring the module (and the kernel's dtype handling)."""
    cd = jnp.dtype(compute_dtype)
    w1, w2 = params["w1"].astype(cd), params["w2"].astype(cd)
    wm, wi = params["wm"].astype(cd), params["wi"].astype(cd)
    h = jnp.dot(x.astype(cd), w1, preferred_element_type=jnp.float32) + params["b1"]
    h = jnp.maximum(h, 0.0).astype(cd)
    h = jnp.dot(h, w2, preferred_element_type=jnp.float32) + params["b2"]
    h = jnp.maximum(h, 0.0).astype(cd)
    mark = jnp.dot(h, wm, preferred_element_type=jnp.float32) + params["bm"]
    log_probs = jax.nn.log_softmax(mark, axis=-1)
    log_int = jnp.dot(h, wi, preferred_element_type=jnp.float32) + params["bi"]
    return {
        "all_log_mark_intensities": log_probs + log_int,
        "total_intensity": jnp.exp(log_int)[:, 0],
    }


if __name__ == "__main__":
    # Module-consistent small shapes: batch=2, seq=8, input_size=32 (time-feature +
    # hidden-state concat), hidden=32, num_layers=2, num_channels=8.
    batch, seq = 2, 8
    input_size, hidden_size, num_channels = 32, 32, 8

    key = jax.random.PRNGKey(0)
    k_t, k_h, k_p, k_big = jax.random.split(key, 4)

    # Two "args" that the module would torch.cat along dim=-1.
    t_feat = jax.random.normal(k_t, (batch, seq, 8), jnp.float32)
    h_state = jax.random.normal(k_h, (batch, seq, 24), jnp.float32)
    x = jnp.concatenate([t_feat, h_state], axis=-1)           # (2, 8, 32)
    assert x.shape[-1] == input_size

    params = init_params(k_p, input_size, hidden_size, num_channels)
    x2d = x.reshape(-1, input_size)                            # (16, 32)

    # ---- f32 path on the module-shaped input (strict check) ----
    prep_f32 = prepare_params(params, jnp.float32)
    out = intensity_net_forward(x2d, prep_f32, tile_m=128)
    out = jax.tree_util.tree_map(jax.block_until_ready, out)
    ref = reference_forward(x2d, params, compute_dtype=jnp.float32)
    assert jnp.allclose(out["all_log_mark_intensities"],
                        ref["all_log_mark_intensities"], atol=1e-5)
    assert jnp.allclose(out["total_intensity"], ref["total_intensity"], atol=1e-5)

    # Restore original (batch, seq, ...) leading shape, matching the PyTorch module.
    all_log = out["all_log_mark_intensities"].reshape(batch, seq, num_channels)
    total = out["total_intensity"].reshape(batch, seq)
    assert all_log.shape == (batch, seq, num_channels)
    assert total.shape == (batch, seq)

    # ---- bf16 production path: larger M, multi-step grid, row padding, lane-dense out ----
    M_big = 1000   # not a multiple of tile_m -> exercises padding path; grid >= 2
    x_big = jax.random.normal(k_big, (M_big, input_size), jnp.float32)
    prep_bf16 = prepare_params(params, jnp.bfloat16)
    out_b = intensity_net_forward(x_big, prep_bf16, tile_m=4096)
    out_b = jax.tree_util.tree_map(jax.block_until_ready, out_b)

    ref_b16 = reference_forward(x_big, params, compute_dtype=jnp.bfloat16)
    ref_b32 = reference_forward(x_big, params, compute_dtype=jnp.float32)
    # Tight check against the dtype-matched reference ...
    assert jnp.allclose(out_b["all_log_mark_intensities"],
                        ref_b16["all_log_mark_intensities"], atol=5e-3)
    assert jnp.allclose(out_b["total_intensity"], ref_b16["total_intensity"], atol=5e-3)
    # ... and bound the bf16-compute drift against the true f32 model.
    assert jnp.allclose(out_b["all_log_mark_intensities"],
                        ref_b32["all_log_mark_intensities"], atol=1e-1)
    assert jnp.allclose(out_b["total_intensity"], ref_b32["total_intensity"], atol=1e-1)

    print("KERNEL_OK")
</pallas_src>

<mosaic_0001>
module attributes {stable_mosaic.version = 11 : i64} {
  func.func @_intensity_net_kernel(%arg0: i32, %arg1: memref<128x32xf32, #tpu.memory_space<vmem>>, %arg2: memref<32x32xf32, #tpu.memory_space<vmem>>, %arg3: memref<1x32xf32, #tpu.memory_space<vmem>>, %arg4: memref<32x32xf32, #tpu.memory_space<vmem>>, %arg5: memref<1x32xf32, #tpu.memory_space<vmem>>, %arg6: memref<32x9xf32, #tpu.memory_space<vmem>>, %arg7: memref<1x9xf32, #tpu.memory_space<vmem>>, %arg8: memref<8x128xf32, #tpu.memory_space<vmem>>, %arg9: memref<128x8xf32, #tpu.memory_space<vmem>>) attributes {dimension_semantics = [#tpu.dimension_semantics<parallel>], iteration_bounds = array<i64: 1>, scalar_prefetch = 0 : i64, scratch_operands = 1 : i64, tpu.core_type = #tpu.core_type<tc>, window_params = [{transform_indices = @transform_0, window_bounds = array<i64: 128, 32>}, {pipeline_mode = #tpu.pipeline_mode<synchronous>, transform_indices = @transform_1, window_bounds = array<i64: 32, 32>}, {pipeline_mode = #tpu.pipeline_mode<synchronous>, transform_indices = @transform_2, window_bounds = array<i64: 1, 32>}, {pipeline_mode = #tpu.pipeline_mode<synchronous>, transform_indices = @transform_3, window_bounds = array<i64: 32, 32>}, {pipeline_mode = #tpu.pipeline_mode<synchronous>, transform_indices = @transform_4, window_bounds = array<i64: 1, 32>}, {pipeline_mode = #tpu.pipeline_mode<synchronous>, transform_indices = @transform_5, window_bounds = array<i64: 32, 9>}, {pipeline_mode = #tpu.pipeline_mode<synchronous>, transform_indices = @transform_6, window_bounds = array<i64: 1, 9>}, {transform_indices = @transform_7, window_bounds = array<i64: 8, 128>}]} {
    %c0 = arith.constant 0 : index
    %c0_0 = arith.constant 0 : index
    %0 = vector.load %arg1[%c0, %c0_0] : memref<128x32xf32, #tpu.memory_space<vmem>>, vector<128x32xf32>
    %c0_1 = arith.constant 0 : index
    %c0_2 = arith.constant 0 : index
    %1 = vector.load %arg2[%c0_1, %c0_2] : memref<32x32xf32, #tpu.memory_space<vmem>>, vector<32x32xf32>
    %cst = arith.constant dense<0.000000e+00> : vector<128x32xf32>
    %2 = tpu.matmul %0, %1, %cst {dimension_numbers = #tpu.dot_dimension_numbers<[1], [0], [0], [1], [0, 0, 1, 1], [], []>} : vector<128x32xf32>, vector<32x32xf32>, vector<128x32xf32> -> vector<128x32xf32>
    %c0_3 = arith.constant 0 : index
    %c0_4 = arith.constant 0 : index
    %3 = vector.load %arg3[%c0_3, %c0_4] : memref<1x32xf32, #tpu.memory_space<vmem>>, vector<1x32xf32>
    %4 = vector.broadcast %3 : vector<1x32xf32> to vector<128x32xf32>
    %5 = arith.addf %2, %4 : vector<128x32xf32>
    %cst_5 = arith.constant 0.000000e+00 : f32
    %6 = vector.broadcast %cst_5 : f32 to vector<128x32xf32>
    %7 = arith.maximumf %5, %6 : vector<128x32xf32>
    %c0_6 = arith.constant 0 : index
    %c0_7 = arith.constant 0 : index
    %8 = vector.load %arg4[%c0_6, %c0_7] : memref<32x32xf32, #tpu.memory_space<vmem>>, vector<32x32xf32>
    %cst_8 = arith.constant dense<0.000000e+00> : vector<128x32xf32>
    %9 = tpu.matmul %7, %8, %cst_8 {dimension_numbers = #tpu.dot_dimension_numbers<[1], [0], [0], [1], [0, 0, 1, 1], [], []>} : vector<128x32xf32>, vector<32x32xf32>, vector<128x32xf32> -> vector<128x32xf32>
    %c0_9 = arith.constant 0 : index
    %c0_10 = arith.constant 0 : index
    %10 = vector.load %arg5[%c0_9, %c0_10] : memref<1x32xf32, #tpu.memory_space<vmem>>, vector<1x32xf32>
    %11 = vector.broadcast %10 : vector<1x32xf32> to vector<128x32xf32>
    %12 = arith.addf %9, %11 : vector<128x32xf32>
    %cst_11 = arith.constant 0.000000e+00 : f32
    %13 = vector.broadcast %cst_11 : f32 to vector<128x32xf32>
    %14 = arith.maximumf %12, %13 : vector<128x32xf32>
    %c0_12 = arith.constant 0 : index
    %c0_13 = arith.constant 0 : index
    %15 = vector.load %arg6[%c0_12, %c0_13] : memref<32x9xf32, #tpu.memory_space<vmem>>, vector<32x9xf32>
    %cst_14 = arith.constant dense<0.000000e+00> : vector<128x9xf32>
    %16 = tpu.matmul %14, %15, %cst_14 {dimension_numbers = #tpu.dot_dimension_numbers<[1], [0], [0], [1], [0, 0, 1, 1], [], []>} : vector<128x32xf32>, vector<32x9xf32>, vector<128x9xf32> -> vector<128x9xf32>
    %c0_15 = arith.constant 0 : index
    %c0_16 = arith.constant 0 : index
    %17 = vector.load %arg7[%c0_15, %c0_16] : memref<1x9xf32, #tpu.memory_space<vmem>>, vector<1x9xf32>
    %18 = vector.broadcast %17 : vector<1x9xf32> to vector<128x9xf32>
    %19 = arith.addf %16, %18 : vector<128x9xf32>
    %20 = vector.extract_strided_slice %19 {offsets = [0, 0], sizes = [128, 8], strides = [1, 1]} : vector<128x9xf32> to vector<128x8xf32>
    %21 = vector.extract_strided_slice %19 {offsets = [0, 8], sizes = [128, 1], strides = [1, 1]} : vector<128x9xf32> to vector<128x1xf32>
    %cst_17 = arith.constant dense<0xFF800000> : vector<128xf32>
    %22 = vector.multi_reduction <maximumf>, %20, %cst_17 [1] : vector<128x8xf32> to vector<128xf32>
    %23 = vector.shape_cast %22 : vector<128xf32> to vector<128x1xf32>
    %24 = vector.broadcast %23 : vector<128x1xf32> to vector<128x8xf32>
    %25 = arith.subf %20, %24 : vector<128x8xf32>
    %26 = math.exp %25 : vector<128x8xf32>
    %cst_18 = arith.constant dense<0.000000e+00> : vector<128xf32>
    %27 = vector.multi_reduction <add>, %26, %cst_18 [1] : vector<128x8xf32> to vector<128xf32>
    %28 = vector.shape_cast %27 : vector<128xf32> to vector<128x1xf32>
    %29 = math.log %28 : vector<128x1xf32>
    %30 = vector.broadcast %29 : vector<128x1xf32> to vector<128x8xf32>
    %31 = arith.subf %25, %30 : vector<128x8xf32>
    %32 = vector.broadcast %21 : vector<128x1xf32> to vector<128x8xf32>
    %33 = arith.addf %31, %32 : vector<128x8xf32>
    %c0_19 = arith.constant 0 : index
    %c0_20 = arith.constant 0 : index
    %34 = vector.load %arg9[%c0_19, %c0_20] : memref<128x8xf32, #tpu.memory_space<vmem>>, vector<128x8xf32>
    tpu.vector_store %arg9[%c0_19, %c0_20], %33 {strides = array<i32>} : memref<128x8xf32, #tpu.memory_space<vmem>>, vector<128x8xf32>,
    %c0_21 = arith.constant 0 : index
    %c0_22 = arith.constant 0 : index
    %35 = tpu.strided_load %arg9[%c0_21, %c0_22] {strides = array<i32: 16, 1>} : memref<128x8xf32, #tpu.memory_space<vmem>>, vector<8x8xf32>
    %c1 = arith.constant 1 : index
    %c0_23 = arith.constant 0 : index
    %36 = tpu.strided_load %arg9[%c1, %c0_23] {strides = array<i32: 16, 1>} : memref<128x8xf32, #tpu.memory_space<vmem>>, vector<8x8xf32>
    %c2 = arith.constant 2 : index
    %c0_24 = arith.constant 0 : index
    %37 = tpu.strided_load %arg9[%c2, %c0_24] {strides = array<i32: 16, 1>} : memref<128x8xf32, #tpu.memory_space<vmem>>, vector<8x8xf32>
    %c3 = arith.constant 3 : index
    %c0_25 = arith.constant 0 : index
    %38 = tpu.strided_load %arg9[%c3, %c0_25] {strides = array<i32: 16, 1>} : memref<128x8xf32, #tpu.memory_space<vmem>>, vector<8x8xf32>
    %c4 = arith.constant 4 : index
    %c0_26 = arith.constant 0 : index
    %39 = tpu.strided_load %arg9[%c4, %c0_26] {strides = array<i32: 16, 1>} : memref<128x8xf32, #tpu.memory_space<vmem>>, vector<8x8xf32>
    %c5 = arith.constant 5 : index
    %c0_27 = arith.constant 0 : index
    %40 = tpu.strided_load %arg9[%c5, %c0_27] {strides = array<i32: 16, 1>} : memref<128x8xf32, #tpu.memory_space<vmem>>, vector<8x8xf32>
    %c6 = arith.constant 6 : index
    %c0_28 = arith.constant 0 : index
    %41 = tpu.strided_load %arg9[%c6, %c0_28] {strides = array<i32: 16, 1>} : memref<128x8xf32, #tpu.memory_space<vmem>>, vector<8x8xf32>
    %c7 = arith.constant 7 : index
    %c0_29 = arith.constant 0 : index
    %42 = tpu.strided_load %arg9[%c7, %c0_29] {strides = array<i32: 16, 1>} : memref<128x8xf32, #tpu.memory_space<vmem>>, vector<8x8xf32>
    %c8 = arith.constant 8 : index
    %c0_30 = arith.constant 0 : index
    %43 = tpu.strided_load %arg9[%c8, %c0_30] {strides = array<i32: 16, 1>} : memref<128x8xf32, #tpu.memory_space<vmem>>, vector<8x8xf32>
    %c9 = arith.constant 9 : index
    %c0_31 = arith.constant 0 : index
    %44 = tpu.strided_load %arg9[%c9, %c0_31] {strides = array<i32: 16, 1>} : memref<128x8xf32, #tpu.memory_space<vmem>>, vector<8x8xf32>
    %c10 = arith.constant 10 : index
    %c0_32 = arith.constant 0 : index
    %45 = tpu.strided_load %arg9[%c10, %c0_32] {strides = array<i32: 16, 1>} : memref<128x8xf32, #tpu.memory_space<vmem>>, vector<8x8xf32>
    %c11 = arith.constant 11 : index
    %c0_33 = arith.constant 0 : index
    %46 = tpu.strided_load %arg9[%c11, %c0_33] {strides = array<i32: 16, 1>} : memref<128x8xf32, #tpu.memory_space<vmem>>, vector<8x8xf32>
    %c12 = arith.constant 12 : index
    %c0_34 = arith.constant 0 : index
    %47 = tpu.strided_load %arg9[%c12, %c0_34] {strides = array<i32: 16, 1>} : memref<128x8xf32, #tpu.memory_space<vmem>>, vector<8x8xf32>
    %c13 = arith.constant 13 : index
    %c0_35 = arith.constant 0 : index
    %48 = tpu.strided_load %arg9[%c13, %c0_35] {strides = array<i32: 16, 1>} : memref<128x8xf32, #tpu.memory_space<vmem>>, vector<8x8xf32>
    %c14 = arith.constant 14 : index
    %c0_36 = arith.constant 0 : index
    %49 = tpu.strided_load %arg9[%c14, %c0_36] {strides = array<i32: 16, 1>} : memref<128x8xf32, #tpu.memory_space<vmem>>, vector<8x8xf32>
    %c15 = arith.constant 15 : index
    %c0_37 = arith.constant 0 : index
    %50 = tpu.strided_load %arg9[%c15, %c0_37] {strides = array<i32: 16, 1>} : memref<128x8xf32, #tpu.memory_space<vmem>>, vector<8x8xf32>
    %51 = tpu.concatenate %35, %36, %37, %38, %39, %40, %41, %42, %43, %44, %45, %46, %47, %48, %49, %50 in 1 : vector<8x8xf32>, vector<8x8xf32>, vector<8x8xf32>, vector<8x8xf32>, vector<8x8xf32>, vector<8x8xf32>, vector<8x8xf32>, vector<8x8xf32>, vector<8x8xf32>, vector<8x8xf32>, vector<8x8xf32>, vector<8x8xf32>, vector<8x8xf32>, vector<8x8xf32>, vector<8x8xf32>, vector<8x8xf32> -> vector<8x128xf32>
    %c0_38 = arith.constant 0 : index
    %c0_39 = arith.constant 0 : index
    %52 = vector.load %arg8[%c0_38, %c0_39] : memref<8x128xf32, #tpu.memory_space<vmem>>, vector<8x128xf32>
    tpu.vector_store %arg8[%c0_38, %c0_39], %51 {strides = array<i32>} : memref<8x128xf32, #tpu.memory_space<vmem>>, vector<8x128xf32>,
    return
  }
  func.func @transform_0(%arg0: i32) -> (i32, i32) {
    %c0_i32 = arith.constant 0 : i32
    %c0_i32_0 = arith.constant 0 : i32
    return %arg0, %c0_i32 : i32, i32
  }
  func.func @transform_1(%arg0: i32) -> (i32, i32) {
    %c0_i32 = arith.constant 0 : i32
    %c0_i32_0 = arith.constant 0 : i32
    %c0_i32_1 = arith.constant 0 : i32
    return %c0_i32, %c0_i32_0 : i32, i32
  }
  func.func @transform_2(%arg0: i32) -> (i32, i32) {
    %c0_i32 = arith.constant 0 : i32
    %c0_i32_0 = arith.constant 0 : i32
    %c0_i32_1 = arith.constant 0 : i32
    return %c0_i32, %c0_i32_0 : i32, i32
  }
  func.func @transform_3(%arg0: i32) -> (i32, i32) {
    %c0_i32 = arith.constant 0 : i32
    %c0_i32_0 = arith.constant 0 : i32
    %c0_i32_1 = arith.constant 0 : i32
    return %c0_i32, %c0_i32_0 : i32, i32
  }
  func.func @transform_4(%arg0: i32) -> (i32, i32) {
    %c0_i32 = arith.constant 0 : i32
    %c0_i32_0 = arith.constant 0 : i32
    %c0_i32_1 = arith.constant 0 : i32
    return %c0_i32, %c0_i32_0 : i32, i32
  }
  func.func @transform_5(%arg0: i32) -> (i32, i32) {
    %c0_i32 = arith.constant 0 : i32
    %c0_i32_0 = arith.constant 0 : i32
    %c0_i32_1 = arith.constant 0 : i32
    return %c0_i32, %c0_i32_0 : i32, i32
  }
  func.func @transform_6(%arg0: i32) -> (i32, i32) {
    %c0_i32 = arith.constant 0 : i32
    %c0_i32_0 = arith.constant 0 : i32
    %c0_i32_1 = arith.constant 0 : i32
    return %c0_i32, %c0_i32_0 : i32, i32
  }
  func.func @transform_7(%arg0: i32) -> (i32, i32) {
    %c0_i32 = arith.constant 0 : i32
    %c0_i32_0 = arith.constant 0 : i32
    return %arg0, %c0_i32 : i32, i32
  }
}

module attributes {stable_mosaic.version = 11 : i64} {
  func.func @_intensity_net_kernel(%arg0: i32, %arg1: memref<8x32xf32, #tpu.memory_space<vmem>>, %arg2: memref<32x32xf32, #tpu.memory_space<vmem>>, %arg3: memref<1x32xf32, #tpu.memory_space<vmem>>, %arg4: memref<32x32xf32, #tpu.memory_space<vmem>>, %arg5: memref<1x32xf32, #tpu.memory_space<vmem>>, %arg6: memref<32x9xf32, #tpu.memory_space<vmem>>, %arg7: memref<1x9xf32, #tpu.memory_space<vmem>>, %arg8: memref<8x8xf32, #tpu.memory_space<vmem>>) attributes {dimension_semantics = [#tpu.dimension_semantics<parallel>], iteration_bounds = array<i64: 2>, scalar_prefetch = 0 : i64, scratch_operands = 0 : i64, tpu.core_type = #tpu.core_type<tc>, window_params = [{transform_indices = @transform_0, window_bounds = array<i64: 8, 32>}, {pipeline_mode = #tpu.pipeline_mode<synchronous>, transform_indices = @transform_1, window_bounds = array<i64: 32, 32>}, {pipeline_mode = #tpu.pipeline_mode<synchronous>, transform_indices = @transform_2, window_bounds = array<i64: 1, 32>}, {pipeline_mode = #tpu.pipeline_mode<synchronous>, transform_indices = @transform_3, window_bounds = array<i64: 32, 32>}, {pipeline_mode = #tpu.pipeline_mode<synchronous>, transform_indices = @transform_4, window_bounds = array<i64: 1, 32>}, {pipeline_mode = #tpu.pipeline_mode<synchronous>, transform_indices = @transform_5, window_bounds = array<i64: 32, 9>}, {pipeline_mode = #tpu.pipeline_mode<synchronous>, transform_indices = @transform_6, window_bounds = array<i64: 1, 9>}, {transform_indices = @transform_7, window_bounds = array<i64: 8, 8>}]} {
    %c0 = arith.constant 0 : index
    %c0_0 = arith.constant 0 : index
    %0 = vector.load %arg1[%c0, %c0_0] : memref<8x32xf32, #tpu.memory_space<vmem>>, vector<8x32xf32>
    %c0_1 = arith.constant 0 : index
    %c0_2 = arith.constant 0 : index
    %1 = vector.load %arg2[%c0_1, %c0_2] : memref<32x32xf32, #tpu.memory_space<vmem>>, vector<32x32xf32>
    %cst = arith.constant dense<0.000000e+00> : vector<8x32xf32>
    %2 = tpu.matmul %0, %1, %cst {dimension_numbers = #tpu.dot_dimension_numbers<[1], [0], [0], [1], [0, 0, 1, 1], [], []>} : vector<8x32xf32>, vector<32x32xf32>, vector<8x32xf32> -> vector<8x32xf32>
    %c0_3 = arith.constant 0 : index
    %c0_4 = arith.constant 0 : index
    %3 = vector.load %arg3[%c0_3, %c0_4] : memref<1x32xf32, #tpu.memory_space<vmem>>, vector<1x32xf32>
    %4 = vector.broadcast %3 : vector<1x32xf32> to vector<8x32xf32>
    %5 = arith.addf %2, %4 : vector<8x32xf32>
    %cst_5 = arith.constant 0.000000e+00 : f32
    %6 = vector.broadcast %cst_5 : f32 to vector<8x32xf32>
    %7 = arith.maximumf %5, %6 : vector<8x32xf32>
    %c0_6 = arith.constant 0 : index
    %c0_7 = arith.constant 0 : index
    %8 = vector.load %arg4[%c0_6, %c0_7] : memref<32x32xf32, #tpu.memory_space<vmem>>, vector<32x32xf32>
    %cst_8 = arith.constant dense<0.000000e+00> : vector<8x32xf32>
    %9 = tpu.matmul %7, %8, %cst_8 {dimension_numbers = #tpu.dot_dimension_numbers<[1], [0], [0], [1], [0, 0, 1, 1], [], []>} : vector<8x32xf32>, vector<32x32xf32>, vector<8x32xf32> -> vector<8x32xf32>
    %c0_9 = arith.constant 0 : index
    %c0_10 = arith.constant 0 : index
    %10 = vector.load %arg5[%c0_9, %c0_10] : memref<1x32xf32, #tpu.memory_space<vmem>>, vector<1x32xf32>
    %11 = vector.broadcast %10 : vector<1x32xf32> to vector<8x32xf32>
    %12 = arith.addf %9, %11 : vector<8x32xf32>
    %cst_11 = arith.constant 0.000000e+00 : f32
    %13 = vector.broadcast %cst_11 : f32 to vector<8x32xf32>
    %14 = arith.maximumf %12, %13 : vector<8x32xf32>
    %c0_12 = arith.constant 0 : index
    %c0_13 = arith.constant 0 : index
    %15 = vector.load %arg6[%c0_12, %c0_13] : memref<32x9xf32, #tpu.memory_space<vmem>>, vector<32x9xf32>
    %cst_14 = arith.constant dense<0.000000e+00> : vector<8x9xf32>
    %16 = tpu.matmul %14, %15, %cst_14 {dimension_numbers = #tpu.dot_dimension_numbers<[1], [0], [0], [1], [0, 0, 1, 1], [], []>} : vector<8x32xf32>, vector<32x9xf32>, vector<8x9xf32> -> vector<8x9xf32>
    %c0_15 = arith.constant 0 : index
    %c0_16 = arith.constant 0 : index
    %17 = vector.load %arg7[%c0_15, %c0_16] : memref<1x9xf32, #tpu.memory_space<vmem>>, vector<1x9xf32>
    %18 = vector.broadcast %17 : vector<1x9xf32> to vector<8x9xf32>
    %19 = arith.addf %16, %18 : vector<8x9xf32>
    %20 = vector.extract_strided_slice %19 {offsets = [0, 0], sizes = [8, 8], strides = [1, 1]} : vector<8x9xf32> to vector<8x8xf32>
    %21 = vector.extract_strided_slice %19 {offsets = [0, 8], sizes = [8, 1], strides = [1, 1]} : vector<8x9xf32> to vector<8x1xf32>
    %cst_17 = arith.constant dense<0xFF800000> : vector<8xf32>
    %22 = vector.multi_reduction <maximumf>, %20, %cst_17 [1] : vector<8x8xf32> to vector<8xf32>
    %23 = vector.shape_cast %22 : vector<8xf32> to vector<8x1xf32>
    %24 = vector.broadcast %23 : vector<8x1xf32> to vector<8x8xf32>
    %25 = arith.subf %20, %24 : vector<8x8xf32>
    %26 = math.exp %25 : vector<8x8xf32>
    %cst_18 = arith.constant dense<0.000000e+00> : vector<8xf32>
    %27 = vector.multi_reduction <add>, %26, %cst_18 [1] : vector<8x8xf32> to vector<8xf32>
    %28 = vector.shape_cast %27 : vector<8xf32> to vector<8x1xf32>
    %29 = math.log %28 : vector<8x1xf32>
    %30 = vector.broadcast %29 : vector<8x1xf32> to vector<8x8xf32>
    %31 = arith.subf %25, %30 : vector<8x8xf32>
    %32 = vector.broadcast %21 : vector<8x1xf32> to vector<8x8xf32>
    %33 = arith.addf %31, %32 : vector<8x8xf32>
    %c0_19 = arith.constant 0 : index
    %c0_20 = arith.constant 0 : index
    %34 = vector.load %arg8[%c0_19, %c0_20] : memref<8x8xf32, #tpu.memory_space<vmem>>, vector<8x8xf32>
    tpu.vector_store %arg8[%c0_19, %c0_20], %33 {strides = array<i32>} : memref<8x8xf32, #tpu.memory_space<vmem>>, vector<8x8xf32>,
    return
  }
  func.func @transform_0(%arg0: i32) -> (i32, i32) {
    %c0_i32 = arith.constant 0 : i32
    %c0_i32_0 = arith.constant 0 : i32
    return %arg0, %c0_i32 : i32, i32
  }
  func.func @transform_1(%arg0: i32) -> (i32, i32) {
    %c0_i32 = arith.constant 0 : i32
    %c0_i32_0 = arith.constant 0 : i32
    %c0_i32_1 = arith.constant 0 : i32
    return %c0_i32, %c0_i32_0 : i32, i32
  }
  func.func @transform_2(%arg0: i32) -> (i32, i32) {
    %c0_i32 = arith.constant 0 : i32
    %c0_i32_0 = arith.constant 0 : i32
    %c0_i32_1 = arith.constant 0 : i32
    return %c0_i32, %c0_i32_0 : i32, i32
  }
  func.func @transform_3(%arg0: i32) -> (i32, i32) {
    %c0_i32 = arith.constant 0 : i32
    %c0_i32_0 = arith.constant 0 : i32
    %c0_i32_1 = arith.constant 0 : i32
    return %c0_i32, %c0_i32_0 : i32, i32
  }
  func.func @transform_4(%arg0: i32) -> (i32, i32) {
    %c0_i32 = arith.constant 0 : i32
    %c0_i32_0 = arith.constant 0 : i32
    %c0_i32_1 = arith.constant 0 : i32
    return %c0_i32, %c0_i32_0 : i32, i32
  }
  func.func @transform_5(%arg0: i32) -> (i32, i32) {
    %c0_i32 = arith.constant 0 : i32
    %c0_i32_0 = arith.constant 0 : i32
    %c0_i32_1 = arith.constant 0 : i32
    return %c0_i32, %c0_i32_0 : i32, i32
  }
  func.func @transform_6(%arg0: i32) -> (i32, i32) {
    %c0_i32 = arith.constant 0 : i32
    %c0_i32_0 = arith.constant 0 : i32
    %c0_i32_1 = arith.constant 0 : i32
    return %c0_i32, %c0_i32_0 : i32, i32
  }
  func.func @transform_7(%arg0: i32) -> (i32, i32) {
    %c0_i32 = arith.constant 0 : i32
    %c0_i32_0 = arith.constant 0 : i32
    return %arg0, %c0_i32 : i32, i32
  }
}

</mosaic_0001>

<bundles_post_ra>
// kernel: tpu_custom_call.1
= control target key start
LH: loop header
LB: loop body
LE: loop exit
PB: predicated region body
PF: predicated region fallthrough
CT: control target
= control target key end

     0   :  { %vm54_vm0 = vcmask 261120   ;;  %s2025_s0 = inlined_call_operand.vmem [shape: f32[128,32], index: 0, kind: input, shape index: {}]   ;;  %s2026_s1 = inlined_call_operand.vmem [shape: f32[32,32], index: 1, kind: input, shape index: {}]   ;;  %s2027_s2 = inlined_call_operand.vmem [shape: f32[1,32], index: 2, kind: input, shape index: {}]   ;;  %s2028_s3 = inlined_call_operand.vmem [shape: f32[32,32], index: 3, kind: input, shape index: {}]   ;;  %s2029_s4 = inlined_call_operand.vmem [shape: f32[1,32], index: 4, kind: input, shape index: {}]   ;;  %s2030_s5 = inlined_call_operand.vmem [shape: f32[32,9], index: 5, kind: input, shape index: {}]   ;;  %s2031_s6 = inlined_call_operand.vmem [shape: f32[1,9], index: 6, kind: input, shape index: {}]   ;;  %s2032_s7 = inlined_call_operand.hbm [shape: f32[8,128], index: 7, kind: output, shape index: {}]  }
   0x1   :  { %v43_v0 = vld [vmem:[%s2026_s1] sm:$0xff]  ;;  %v44_v1 = vld [vmem:[%s2026_s1 + $0x8] sm:$0xff]  ;;  %v45_v2 = vld [vmem:[%s2026_s1 + $0x10] sm:$0xff] }
   0x2   :  { %v1430_v3 = vpack.c.bf16 %v44_v1, %v43_v0  ;;  %v46_v4 = vld [vmem:[%s2026_s1 + $0x18] sm:$0xff]  ;;  %v27_v5 = vld [vmem:[%s2025_s0] sm:$0xff]  ;;  %v265_v9 = vld [vmem:[%s2028_s3 + $0x8] sm:$0xff] }
   0x3   :  { %v1434_v6 = vpack.c.bf16 %v46_v4, %v45_v2  ;;  %1342 = vmatprep.mubr.msk.f32.mxu0 %vm54_vm0, %v27_v5  ;;  %v35_v7 = vld [vmem:[%s2025_s0 + $0x40] sm:$0xff]  ;;  %v266_v11 = vld [vmem:[%s2028_s3 + $0x10] sm:$0xff]  ;;  %v267_v12 = vld [vmem:[%s2028_s3 + $0x18] sm:$0xff] }
   0x4   :  { %1431 = vmatprep.subr.bf16.mxu0 %v1430_v3  ;;  %1454 = vmatprep.subr.bf16.mxu1 %v1430_v3  ;;  %v264_v8 = vld [vmem:[%s2028_s3] sm:$0xff]  ;;  %v28_v13 = vld [vmem:[%s2025_s0 + $0x8] sm:$0xff] }
   0x5   :  { %1433 = vmatpush3.bf16.msra.mxu0 %v1430_v3  ;;  %1456 = vmatpush3.bf16.msra.mxu1 %v1430_v3  ;;  %v1438_v10 = vpack.c.bf16 %v265_v9, %v264_v8  ;;  %v36_v14 = vld [vmem:[%s2025_s0 + $0x48] sm:$0xff] }
   0x6   :  { %1435 = vmatprep.subr.bf16.mxu0 %v1434_v6  ;;  %1455 = vmatprep.subr.bf16.mxu1 %v1434_v6 }
   0x7   :  { %1354 = vmatprep.mubr.msk.f32.mxu1 %vm54_vm0, %v35_v7 }
   0x9   :  { %1437 = vmatpush3.bf16.msra.mxu0 %v1434_v6  ;;  %1457 = vmatpush3.bf16.msra.mxu1 %v1434_v6 }
   0xa   :  { %12 = vsyncpa [#allocation4], 0  ;;  %v29_v15 = vld [vmem:[%s2025_s0 + $0x10] sm:$0xff]  ;;  %1439 = vmatprep.subr.bf16.mxu1 %v1438_v10  ;;  %v1442_v17 = vpack.c.bf16 %v267_v12, %v266_v11  ;;  %v30_v18 = vld [vmem:[%s2025_s0 + $0x18] sm:$0xff]  ;;  %vm688_vm1 = vcmask 64512   ;;  %s1567_s9 = smov 64  }
   0xb   :  { %v37_v16 = vld [vmem:[%s2025_s0 + $0x50] sm:$0xff]  ;;  %v38_v19 = vld [vmem:[%s2025_s0 + $0x58] sm:$0xff]  ;;  %v31_v20 = vld [vmem:[%s2025_s0 + $0x20] sm:$0xff]  ;;  %s1568_s10 = smov 88   ;;  %s1569_s11 = smov 80   ;;  %vm1181_vm2 = vcmask 130048  }
   0xc   :  { %1343 = vmatmul.mubr.msk.f32.vlgmr.msra.gmra.mrb[0].mxu0 %vm54_vm0, %v28_v13  ;;  %1355 = vmatmul.mubr.msk.f32.vlgmr.msra.gmra.mrb[0].mxu1 %vm54_vm0, %v36_v14  ;;  %v39_v21 = vld [vmem:[%s2025_s0 + $0x60] sm:$0xff]  ;;  %v32_v22 = vld [vmem:[%s2025_s0 + $0x28] sm:$0xff]  ;;  %v33_v24 = vld [vmem:[%s2025_s0 + $0x30] sm:$0xff]  ;;  %s1570_s12 = smov 8   ;;  %s1571_s1 = smov 16   ;;  %vm1183_vm3 = vcmask 195584  }
   0xd   :  { %1345 = vmatprep.mubr.msk.f32.mxu0 %vm54_vm0, %v29_v15  ;;  %1357 = vmatprep.mubr.msk.f32.mxu1 %vm54_vm0, %v37_v16  ;;  %v40_v23 = vld [vmem:[%s2025_s0 + $0x68] sm:$0xff]  ;;  %v41_v25 = vld [vmem:[%s2025_s0 + $0x70] sm:$0xff]  ;;  %v34_v26 = vld [vmem:[%s2025_s0 + $0x38] sm:$0xff]  ;;  %s1572_s13 = smov 24   ;;  %s1573_s14 = smov 32   ;;  %vm1186_vm4 = vcmask 326656  }
   0xe   :  { %1441 = vmatpush3.bf16.msra.mxu1 %v1438_v10  ;;  %v42_v27 = vld [vmem:[%s2025_s0 + $0x78] sm:$0xff]  ;;  %v484_v28 = vld [vmem:[%s2030_s5] sm:$0xff]  ;;  %v485_v29 = vld [vmem:[%s2030_s5 + $0x8] sm:$0xff]  ;;  %s1574_s15 = smov 40   ;;  %s1575_s16 = smov 48   ;;  %vm1188_vm5 = vcmask 392192  }
   0xf   :  { %1443 = vmatprep.subr.bf16.mxu1 %v1442_v17  ;;  %v1446_v30 = vpack.c.bf16 %v485_v29, %v484_v28  ;;  %v486_v31 = vld [vmem:[%s2030_s5 + $0x10] sm:$0xff]  ;;  %v487_v32 = vld [vmem:[%s2030_s5 + $0x18] sm:$0xff]  ;;  %v1223_v34 = vld [vmem:[%s2027_s2] ss:$0 sm:$0xff]  ;;  %s1576_s17 = smov 56   ;;  %s1577_s18 = smov 96  }
  0x10   :  { %1346 = vmatmul.mubr.msk.f32.gmra.mrb[2].mxu0 %vm54_vm0, %v30_v18  ;;  %1358 = vmatmul.mubr.msk.f32.gmra.mrb[2].mxu1 %vm54_vm0, %v38_v19  ;;  %v1450_v33 = vpack.c.bf16 %v487_v32, %v486_v31  ;;  %v1240_v19 = vld [vmem:[%s2029_s4] ss:$0 sm:$0xff]  ;;  %s1578_s19 = smov 104   ;;  %s1579_s20 = smov 112   ;;  %vm1190_vm6 = vcmask 457728   ;;  %vm1192_vm7 = vcmask 523264  }
  0x11   :  { %1348 = vmatprep.mubr.msk.f32.mxu0 %vm54_vm0, %v31_v20  ;;  %1360 = vmatprep.mubr.msk.f32.mxu1 %vm54_vm0, %v39_v21  ;;  %s1580_s21 = smov 120   ;;  %vm1194_vm8 = vcmask 588800   ;;  %vm1196_vm9 = vcmask 654336   ;;  %vm1198_vm10 = vcmask 719872   ;;  %vm1200_vm11 = vcmask 785408   ;;  %s1581_s22 = smov [#allocation3]  }
  0x12   :  { %1445 = vmatpush3.bf16.msra.mxu1 %v1442_v17  ;;  %1447 = vmatprep.subr.bf16.mxu0 %v1446_v30  ;;  %vm1202_vm12 = vcmask 850944   ;;  %vm1204_vm13 = vcmask 916480   ;;  %s1215_s23 = sshll.u32 %s1581_s22, 4  ;;  %vm1206_vm14 = vcmask 982016   ;;  %s1216_s23 = int_to_ptr.vmem [resolvable:$true] %s1215_s23 }
  0x13   :  { %1449 = vmatpush3.bf16.msra.mxu0 %v1446_v30  ;;  %s1541_s24 = scalar_lea.vmem %s1216_s23, 128  ;;  %p1546_p1 = scmp.lt.s32.totalorder %s1216_s23, %s1216_s23 }
  0x14   :  { %1349 = vmatmul.mubr.msk.f32.gmra.mrb[4].mxu0 %vm54_vm0, %v32_v22  ;;  %1361 = vmatmul.mubr.msk.f32.gmra.mrb[4].mxu1 %vm54_vm0, %v40_v23  ;;  %p1542_p0 = scmp.ne.s32.totalorder %s1216_s23, %s1541_s24  ;;  %p1547_p2 = scmp.lt.s32.totalorder %s1541_s24, %s1541_s24 }
  0x15   :  { %1351 = vmatprep.mubr.msk.f32.mxu0 %vm54_vm0, %v33_v24  ;;  %1363 = vmatprep.mubr.msk.f32.mxu1 %vm54_vm0, %v41_v25 }
  0x16   :  { %1451 = vmatprep.subr.bf16.mxu0 %v1450_v33  ;;  %p1548_p3 = por %p1547_p2, %p1546_p1 }
  0x17   :  { %1453 = vmatpush3.bf16.msra.mxu0 %v1450_v33 }
  0x18   :  { %1352 = vmatmul.mubr.msk.f32.gmra.mrb[6].mxu0 %vm54_vm0, %v34_v26  ;;  %1364 = vmatmul.mubr.msk.f32.gmra.mrb[6].mxu1 %vm54_vm0, %v42_v27  ;;  %p1549_p4 = pnand %p1548_p3, %p1542_p0 }
  0xdf   :  { %v1344_v35 = vpop.f32.mrb[0].mxu0  ;;  %v1356_v36 = vpop.f32.mrb[0].mxu1 }
  0xe0   :  { %v175_v37 = vadd.f32 %v1344_v35, %v1223_v34  ;;  %v169_v38 = vpop.f32.mrb[1].mxu0  ;;  %v209_v39 = vpop.f32.mrb[1].mxu1  ;;  %v215_v3 = vadd.f32 %v1356_v36, %v1223_v34 }
  0xe1   :  { %v170_v40 = vadd.f32 %v1223_v34, %v169_v38  ;;  %v210_v60 = vadd.f32 %v1223_v34, %v209_v39 }
  0xe2   :  { %v249_v44 = vmax.f32 %v175_v37, 0.0  ;;  %v257_v7 = vmax.f32 %v215_v3, 0.0 }
  0xe3   :  { %v248_v41 = vmax.f32 %v170_v40, 0.0  ;;  %v1347_v42 = vpop.f32.mrb[2].mxu0  ;;  %v1359_v43 = vpop.f32.mrb[2].mxu1  ;;  %v256_v5 = vmax.f32 %v210_v60, 0.0 }
  0xe4   :  { %v185_v45 = vadd.f32 %v1347_v42, %v1223_v34  ;;  %v179_v46 = vpop.f32.mrb[3].mxu0  ;;  %v219_v47 = vpop.f32.mrb[3].mxu1  ;;  %v225_v8 = vadd.f32 %v1359_v43, %v1223_v34 }
  0xe5   :  { %1374 = vmatprep.mubr.msk.f32.mxu1 %vm54_vm0, %v248_v41  ;;  %v180_v48 = vadd.f32 %v1223_v34, %v179_v46  ;;  %v220_v6 = vadd.f32 %v1223_v34, %v219_v47 }
  0xe6   :  { %1375 = vmatmul.mubr.msk.f32.vlgmr.msra.gmra.mrb[8].mxu1 %vm54_vm0, %v249_v44  ;;  %v251_v49 = vmax.f32 %v185_v45, 0.0  ;;  %v259_v11 = vmax.f32 %v225_v8, 0.0 }
  0xe7   :  { %v250_v50 = vmax.f32 %v180_v48, 0.0  ;;  %v1350_v51 = vpop.f32.mrb[4].mxu0  ;;  %v1362_v52 = vpop.f32.mrb[4].mxu1  ;;  %v258_v9 = vmax.f32 %v220_v6, 0.0 }
  0xe8   :  { %v195_v53 = vadd.f32 %v1350_v51, %v1223_v34  ;;  %v189_v54 = vpop.f32.mrb[5].mxu0  ;;  %v229_v55 = vpop.f32.mrb[5].mxu1  ;;  %v235_v12 = vadd.f32 %v1362_v52, %v1223_v34 }
  0xe9   :  { %1377 = vmatprep.mubr.msk.f32.mxu1 %vm54_vm0, %v250_v50  ;;  %v190_v56 = vadd.f32 %v1223_v34, %v189_v54  ;;  %v230_v10 = vadd.f32 %v1223_v34, %v229_v55 }
  0xea   :  { %1378 = vmatmul.mubr.msk.f32.gmra.mrb[10].mxu1 %vm54_vm0, %v251_v49  ;;  %v253_v57 = vmax.f32 %v195_v53, 0.0  ;;  %v261_v15 = vmax.f32 %v235_v12, 0.0 }
  0xeb   :  { %v252_v58 = vmax.f32 %v190_v56, 0.0  ;;  %v1353_v59 = vpop.f32.mrb[6].mxu0  ;;  %v1365_v61 = vpop.f32.mrb[6].mxu1  ;;  %v260_v13 = vmax.f32 %v230_v10, 0.0 }
  0xec   :  { %v205_v62 = vadd.f32 %v1353_v59, %v1223_v34  ;;  %v199_v63 = vpop.f32.mrb[7].mxu0  ;;  %v239_v0 = vpop.f32.mrb[7].mxu1  ;;  %v245_v16 = vadd.f32 %v1365_v61, %v1223_v34 }
  0xed   :  { %1380 = vmatprep.mubr.msk.f32.mxu1 %vm54_vm0, %v252_v58  ;;  %v200_v1 = vadd.f32 %v1223_v34, %v199_v63  ;;  %v240_v14 = vadd.f32 %v1223_v34, %v239_v0 }
  0xee   :  { %1381 = vmatmul.mubr.msk.f32.gmra.mrb[12].mxu1 %vm54_vm0, %v253_v57  ;;  %v255_v2 = vmax.f32 %v205_v62, 0.0  ;;  %v263_v18 = vmax.f32 %v245_v16, 0.0 }
  0xef   :  { %v254_v4 = vmax.f32 %v200_v1, 0.0  ;;  %v262_v17 = vmax.f32 %v240_v14, 0.0 }
  0xf1   :  { %1383 = vmatprep.mubr.msk.f32.mxu1 %vm54_vm0, %v254_v4  ;;  %v1565_v4 = vmov 8  }
  0xf2   :  { %1384 = vmatmul.mubr.msk.f32.gmra.mrb[14].mxu1 %vm54_vm0, %v255_v2  ;;  %1475 = vset.pattern.permute.xlu1 %v1565_v4 }
  0xf3   :  { %1386 = vmatprep.mubr.msk.f32.mxu1 %vm54_vm0, %v256_v5  ;;  %1476 = vset.pattern.permute.xlu0 %v1565_v4  ;;  %v1763_v5 = vld [vmem:[%s2031_s6] ss:$0 sm:$0xff]  ;;  %s1566_s6 = smov 72  }
  0xf6   :  { %1387 = vmatmul.mubr.msk.f32.gmra.mrb[16].mxu1 %vm54_vm0, %v257_v7 }
  0xf7   :  { %1389 = vmatprep.mubr.msk.f32.mxu1 %vm54_vm0, %v258_v9 }
  0xfa   :  { %1390 = vmatmul.mubr.msk.f32.gmra.mrb[18].mxu1 %vm54_vm0, %v259_v11 }
  0xfb   :  { %1392 = vmatprep.mubr.msk.f32.mxu1 %vm54_vm0, %v260_v13 }
  0xfe   :  { %1393 = vmatmul.mubr.msk.f32.gmra.mrb[20].mxu1 %vm54_vm0, %v261_v15 }
  0xff   :  { %1395 = vmatprep.mubr.msk.f32.mxu1 %vm54_vm0, %v262_v17 }
 0x102   :  { %1396 = vmatmul.mubr.msk.f32.gmra.mrb[22].mxu1 %vm54_vm0, %v263_v18 }
 0x1b9   :  { %v1376_v20 = vpop.f32.mrb[8].mxu1 }
 0x1ba   :  { %v395_v21 = vadd.f32 %v1376_v20, %v1240_v19  ;;  %v389_v22 = vpop.f32.mrb[9].mxu1 }
 0x1bb   :  { %v390_v23 = vadd.f32 %v1240_v19, %v389_v22 }
 0x1bc   :  { %v469_v26 = vmax.f32 %v395_v21, 0.0 }
 0x1bd   :  { %v468_v24 = vmax.f32 %v390_v23, 0.0  ;;  %v1379_v25 = vpop.f32.mrb[10].mxu1 }
 0x1be   :  { %v405_v27 = vadd.f32 %v1379_v25, %v1240_v19  ;;  %v399_v28 = vpop.f32.mrb[11].mxu1 }
 0x1bf   :  { %1406 = vmatprep.mubr.msk.f32.mxu0 %vm54_vm0, %v468_v24  ;;  %v400_v29 = vadd.f32 %v1240_v19, %v399_v28 }
 0x1c0   :  { %1407 = vmatmul.mubr.msk.f32.vlgmr.msra.gmra.mrb[8].mxu0 %vm54_vm0, %v469_v26  ;;  %v471_v30 = vmax.f32 %v405_v27, 0.0 }
 0x1c1   :  { %v470_v31 = vmax.f32 %v400_v29, 0.0  ;;  %v1382_v32 = vpop.f32.mrb[12].mxu1 }
 0x1c2   :  { %v415_v33 = vadd.f32 %v1382_v32, %v1240_v19  ;;  %v409_v34 = vpop.f32.mrb[13].mxu1 }
 0x1c3   :  { %1409 = vmatprep.mubr.msk.f32.mxu0 %vm54_vm0, %v470_v31  ;;  %v410_v35 = vadd.f32 %v1240_v19, %v409_v34 }
 0x1c4   :  { %1410 = vmatmul.mubr.msk.f32.gmra.mrb[10].mxu0 %vm54_vm0, %v471_v30  ;;  %v473_v36 = vmax.f32 %v415_v33, 0.0 }
 0x1c5   :  { %v472_v37 = vmax.f32 %v410_v35, 0.0  ;;  %v1385_v38 = vpop.f32.mrb[14].mxu1 }
 0x1c6   :  { %v425_v39 = vadd.f32 %v1385_v38, %v1240_v19  ;;  %v419_v40 = vpop.f32.mrb[15].mxu1 }
 0x1c7   :  { %1412 = vmatprep.mubr.msk.f32.mxu0 %vm54_vm0, %v472_v37  ;;  %v420_v41 = vadd.f32 %v1240_v19, %v419_v40 }
 0x1c8   :  { %1413 = vmatmul.mubr.msk.f32.gmra.mrb[12].mxu0 %vm54_vm0, %v473_v36  ;;  %v475_v42 = vmax.f32 %v425_v39, 0.0 }
 0x1c9   :  { %v474_v43 = vmax.f32 %v420_v41, 0.0  ;;  %v1388_v44 = vpop.f32.mrb[16].mxu1 }
 0x1ca   :  { %v435_v45 = vadd.f32 %v1388_v44, %v1240_v19  ;;  %v429_v46 = vpop.f32.mrb[17].mxu1 }
 0x1cb   :  { %v430_v47 = vadd.f32 %v1240_v19, %v429_v46  ;;  %1415 = vmatprep.mubr.msk.f32.mxu0 %vm54_vm0, %v474_v43 }
 0x1cc   :  { %v477_v48 = vmax.f32 %v435_v45, 0.0  ;;  %1416 = vmatmul.mubr.msk.f32.gmra.mrb[14].mxu0 %vm54_vm0, %v475_v42 }
 0x1cd   :  { %v476_v49 = vmax.f32 %v430_v47, 0.0  ;;  %v1391_v50 = vpop.f32.mrb[18].mxu1 }
 0x1ce   :  { %v445_v51 = vadd.f32 %v1391_v50, %v1240_v19  ;;  %v439_v52 = vpop.f32.mrb[19].mxu1 }
 0x1cf   :  { %v440_v53 = vadd.f32 %v1240_v19, %v439_v52  ;;  %1418 = vmatprep.mubr.msk.f32.mxu0 %vm54_vm0, %v476_v49 }
 0x1d0   :  { %v479_v54 = vmax.f32 %v445_v51, 0.0  ;;  %1419 = vmatmul.mubr.msk.f32.gmra.mrb[16].mxu0 %vm54_vm0, %v477_v48 }
 0x1d1   :  { %v478_v55 = vmax.f32 %v440_v53, 0.0  ;;  %v1394_v56 = vpop.f32.mrb[20].mxu1 }
 0x1d2   :  { %v455_v57 = vadd.f32 %v1394_v56, %v1240_v19  ;;  %v449_v58 = vpop.f32.mrb[21].mxu1 }
 0x1d3   :  { %v450_v59 = vadd.f32 %v1240_v19, %v449_v58  ;;  %1421 = vmatprep.mubr.msk.f32.mxu0 %vm54_vm0, %v478_v55 }
 0x1d4   :  { %v481_v60 = vmax.f32 %v455_v57, 0.0  ;;  %1422 = vmatmul.mubr.msk.f32.gmra.mrb[18].mxu0 %vm54_vm0, %v479_v54 }
 0x1d5   :  { %v480_v61 = vmax.f32 %v450_v59, 0.0  ;;  %v1397_v62 = vpop.f32.mrb[22].mxu1 }
 0x1d6   :  { %v465_v63 = vadd.f32 %v1397_v62, %v1240_v19  ;;  %v459_v0 = vpop.f32.mrb[23].mxu1 }
 0x1d7   :  { %1424 = vmatprep.mubr.msk.f32.mxu0 %vm54_vm0, %v480_v61  ;;  %v460_v1 = vadd.f32 %v1240_v19, %v459_v0 }
 0x1d8   :  { %1425 = vmatmul.mubr.msk.f32.gmra.mrb[20].mxu0 %vm54_vm0, %v481_v60  ;;  %v483_v2 = vmax.f32 %v465_v63, 0.0 }
 0x1d9   :  { %v482_v3 = vmax.f32 %v460_v1, 0.0 }
 0x1db   :  { %1427 = vmatprep.mubr.msk.f32.mxu0 %vm54_vm0, %v482_v3 }
 0x1dc   :  { %1428 = vmatmul.mubr.msk.f32.gmra.mrb[22].mxu0 %vm54_vm0, %v483_v2 }
 0x293   :  { %v1408_v6 = vpop.f32.mrb[8].mxu0 }
 0x294   :  { %v615_v7 = vadd.f32 %v1408_v6, %v1763_v5  ;;  %v609_v8 = vpop.f32.mrb[9].mxu0 }
 0x295   :  { %v610_v20 = vadd.f32 %v1763_v5, %v609_v8 }
 0x296   :  { %888 = vperm.xlu1 %1475, %v615_v7   ;;  %v692_v9 = vsel %vm688_vm1, %v615_v7, -inf }
 0x297   :  { %693 = vmax.xlane.f32.xlu0 %v692_v9  ;;  %v1411_v10 = vpop.f32.mrb[10].mxu0  ;;  %v689_v26 = vsel %vm688_vm1, %v610_v20, -inf }
 0x298   :  { %v619_v11 = vpop.f32.mrb[11].mxu0  ;;  %v1771_v23 = vadd.f32 %v1411_v10, %v1763_v5 }
 0x299   :  { %v1776_v25 = vadd.f32 %v1763_v5, %v619_v11 }
 0x29a   :  { %v698_v24 = vsel %vm688_vm1, %v1771_v23, -inf }
 0x29b   :  { %v1414_v12 = vpop.f32.mrb[12].mxu0  ;;  %v695_v29 = vsel %vm688_vm1, %v1776_v25, -inf }
 0x29c   :  { %v629_v13 = vpop.f32.mrb[13].mxu0  ;;  %v1784_v28 = vadd.f32 %v1414_v12, %v1763_v5 }
 0x29d   :  { %v1781_v27 = vadd.f32 %v1763_v5, %v629_v13 }
 0x29e   :  { %v704_v31 = vsel %vm688_vm1, %v1784_v28, -inf }
 0x29f   :  { %v1417_v14 = vpop.f32.mrb[14].mxu0  ;;  %v701_v42 = vsel %vm688_vm1, %v1781_v27, -inf }
 0x2a0   :  { %v639_v15 = vpop.f32.mrb[15].mxu0  ;;  %v1816_v41 = vadd.f32 %v1417_v14, %v1763_v5 }
 0x2a1   :  { %v1829_v45 = vadd.f32 %v1763_v5, %v639_v15 }
 0x2a2   :  { %v710_v43 = vsel %vm688_vm1, %v1816_v41, -inf }
 0x2a3   :  { %v1420_v16 = vpop.f32.mrb[16].mxu0  ;;  %v707_v49 = vsel %vm688_vm1, %v1829_v45, -inf }
 0x2a4   :  { %v649_v17 = vpop.f32.mrb[17].mxu0  ;;  %v1790_v30 = vadd.f32 %v1420_v16, %v1763_v5 }
 0x2a5   :  { %v1795_v32 = vadd.f32 %v1763_v5, %v649_v17 }
 0x2a6   :  { %v716_v33 = vsel %vm688_vm1, %v1790_v30, -inf }
 0x2a7   :  { %v1423_v18 = vpop.f32.mrb[18].mxu0  ;;  %v713_v35 = vsel %vm688_vm1, %v1795_v32, -inf }
 0x2a8   :  { %v1767_v19 = vpop.f32.mrb[19].mxu0  ;;  %v1824_v44 = vadd.f32 %v1423_v18, %v1763_v5 }
 0x2a9   :  { %v1855_v1 = vadd.f32 %v1763_v5, %v1767_v19 }
 0x2aa   :  { %v722_v57 = vsel %vm688_vm1, %v1824_v44, -inf }
 0x2ab   :  { %v1426_v21 = vpop.f32.mrb[20].mxu0 }
 0x2ac   :  { %v669_v22 = vpop.f32.mrb[21].mxu0  ;;  %v1800_v34 = vadd.f32 %v1426_v21, %v1763_v5 }
 0x2ad   :  { %883 = vperm.xlu0 %1476, %v610_v20   ;;  %v1805_v36 = vadd.f32 %v1763_v5, %v669_v22 }
 0x2ae   :  { %v728_v37 = vsel %vm688_vm1, %v1800_v34, -inf }
 0x2af   :  { %v725_v38 = vsel %vm688_vm1, %v1805_v36, -inf  ;;  %v1811_v39 = vpop.f32.mrb[22].mxu0 }
 0x2b0   :  { %v1813_v40 = vpop.f32.mrb[23].mxu0 }
 0x2ba   :  { %699 = vmax.xlane.f32.xlu1 %v698_v24 }
 0x2cb   :  { %893 = vperm.xlu1 %1475, %v1776_v25  }
 0x2cc   :  { %690 = vmax.xlane.f32.xlu0 %v689_v26 }
 0x2cf   :  { %903 = vperm.xlu1 %1475, %v1781_v27  }
 0x2d0   :  { %696 = vmax.xlane.f32.xlu0 %v695_v29 }
 0x2d4   :  { %705 = vmax.xlane.f32.xlu0 %v704_v31  ;;  %v719_v31 = vsel %vm688_vm1, %v1855_v1, -inf }
 0x2d8   :  { %717 = vmax.xlane.f32.xlu0 %v716_v33 }
 0x2dc   :  { %714 = vmax.xlane.f32.xlu0 %v713_v35 }
 0x2e0   :  { %729 = vmax.xlane.f32.xlu0 %v728_v37 }
 0x2e4   :  { %726 = vmax.xlane.f32.xlu0 %v725_v38 }
 0x2f3   :  { %702 = vmax.xlane.f32.xlu1 %v701_v42 }
 0x2f7   :  { %711 = vmax.xlane.f32.xlu1 %v710_v43  ;;  %v1898_v43 = vadd.f32 %v1811_v39, %v1763_v5  ;;  %v1911_v39 = vadd.f32 %v1763_v5, %v1813_v40 }
 0x2fa   :  { %898 = vperm.xlu0 %1476, %v1771_v23  }
 0x2fe   :  { %918 = vperm.xlu0 %1476, %v1816_v41  }
 0x302   :  { %938 = vperm.xlu0 %1476, %v1824_v44  }
 0x308   :  { %913 = vperm.xlu1 %1475, %v1829_v45  }
 0x315   :  { %v889_v63 = vpop.permute.xlu1 %888 }
 0x324   :  { %v694_v46 = vpop.xlane.xlu0 %693 }
 0x325   :  { %v1832_v47 = vsub.f32 %v615_v7, %v694_v46 }
 0x327   :  { %v755_v48 = vmul.f32 1.442695, %v1832_v47 }
 0x329   :  { %1477 = vpow2.f32 %v755_v48 }
 0x32c   :  { %708 = vmax.xlane.f32.xlu1 %v707_v49  ;;  %v1839_v52 = vpop.permute.xlu0 %883 }
 0x333   :  { %v1478_v50 = vpop.eup %1477 }
 0x334   :  { %v788_v51 = vsel %vm688_vm1, %v1478_v50, 0.0 }
 0x335   :  { %789 = vadd.xlane.f32.xlu0 %v788_v51 }
 0x33d   :  { %923 = vperm.xlu1 %1475, %v1795_v32  }
 0x347   :  { %v1857_v2 = vpop.xlane.xlu1 %699 }
 0x34b   :  { %v1861_v4 = vpop.permute.xlu1 %893 }
 0x34f   :  { %v1863_v7 = vpop.permute.xlu1 %903 }
 0x359   :  { %v691_v53 = vpop.xlane.xlu0 %690 }
 0x35a   :  { %v1841_v54 = vsub.f32 %v610_v20, %v691_v53 }
 0x35c   :  { %v753_v55 = vmul.f32 1.442695, %v1841_v54 }
 0x35d   :  { %v1844_v56 = vpop.xlane.xlu0 %696 }
 0x35e   :  { %1479 = vpow2.f32 %v753_v55 }
 0x361   :  { %723 = vmax.xlane.f32.xlu1 %v722_v57  ;;  %v706_v58 = vpop.xlane.xlu0 %705 }
 0x362   :  { %v1849_v59 = vsub.f32 %v1784_v28, %v706_v58 }
 0x364   :  { %v763_v60 = vmul.f32 1.442695, %v1849_v59 }
 0x365   :  { %v718_v6 = vpop.xlane.xlu0 %717 }
 0x366   :  { %1481 = vpow2.f32 %v763_v60  ;;  %v1866_v9 = vsub.f32 %v1790_v30, %v718_v6  ;;  %v731_v60 = vsel %vm688_vm1, %v1911_v39, -inf }
 0x368   :  { %v1480_v61 = vpop.eup %1479  ;;  %v771_v13 = vmul.f32 1.442695, %v1866_v9 }
 0x369   :  { %v785_v62 = vsel %vm688_vm1, %v1480_v61, 0.0  ;;  %v715_v8 = vpop.xlane.xlu0 %714 }
 0x36a   :  { %786 = vadd.xlane.f32.xlu0 %v785_v62  ;;  %v1873_v14 = vsub.f32 %v1795_v32, %v715_v8 }
 0x36c   :  { %v769_v16 = vmul.f32 1.442695, %v1873_v14 }
 0x36d   :  { %v730_v12 = vpop.xlane.xlu0 %729 }
 0x36e   :  { %v1878_v17 = vsub.f32 %v1800_v34, %v730_v12 }
 0x370   :  { %v1482_v0 = vpop.eup %1481  ;;  %v779_v19 = vmul.f32 1.442695, %v1878_v17 }
 0x371   :  { %v800_v3 = vsel %vm688_vm1, %v1482_v0, 0.0  ;;  %v727_v18 = vpop.xlane.xlu0 %726 }
 0x372   :  { %933 = vperm.xlu1 %1475, %v1855_v1   ;;  %801 = vadd.xlane.f32.xlu0 %v800_v3  ;;  %v1882_v20 = vsub.f32 %v1805_v36, %v727_v18 }
 0x374   :  { %v777_v22 = vmul.f32 1.442695, %v1882_v20 }
 0x379   :  { %v1894_v42 = vpop.permute.xlu0 %898 }
 0x37d   :  { %v1901_v46 = vpop.permute.xlu0 %918 }
 0x380   :  { %v703_v10 = vpop.xlane.xlu1 %702 }
 0x381   :  { %v1869_v11 = vsub.f32 %v1781_v27, %v703_v10  ;;  %v1903_v48 = vpop.permute.xlu0 %938 }
 0x383   :  { %v761_v15 = vmul.f32 1.442695, %v1869_v11 }
 0x384   :  { %v712_v61 = vpop.xlane.xlu1 %711 }
 0x385   :  { %1483 = vpow2.f32 %v761_v15 }
 0x386   :  { %1485 = vpow2.f32 %v771_v13  ;;  %v1932_v13 = vsub.f32 %v1776_v25, %v1844_v56 }
 0x387   :  { %1487 = vpow2.f32 %v769_v16 }
 0x388   :  { %1489 = vpow2.f32 %v779_v19 }
 0x389   :  { %1491 = vpow2.f32 %v777_v22 }
 0x38f   :  { %v1484_v21 = vpop.eup %1483 }
 0x390   :  { %v797_v24 = vsel %vm688_vm1, %v1484_v21, 0.0  ;;  %v1486_v26 = vpop.eup %1485  ;;  %v757_v21 = vmul.f32 1.442695, %v1932_v13 }
 0x391   :  { %798 = vadd.xlane.f32.xlu0 %v797_v24  ;;  %v812_v27 = vsel %vm688_vm1, %v1486_v26, 0.0  ;;  %v1488_v29 = vpop.eup %1487 }
 0x392   :  { %v809_v32 = vsel %vm688_vm1, %v1488_v29, 0.0  ;;  %v1490_v33 = vpop.eup %1489 }
 0x393   :  { %v824_v35 = vsel %vm688_vm1, %v1490_v33, 0.0  ;;  %v1492_v37 = vpop.eup %1491 }
 0x394   :  { %v821_v38 = vsel %vm688_vm1, %v1492_v37, 0.0 }
 0x395   :  { %813 = vadd.xlane.f32.xlu0 %v812_v27 }
 0x396   :  { %720 = vmax.xlane.f32.xlu1 %v719_v31 }
 0x399   :  { %810 = vadd.xlane.f32.xlu0 %v809_v32 }
 0x39d   :  { %825 = vadd.xlane.f32.xlu0 %v824_v35 }
 0x3a1   :  { %822 = vadd.xlane.f32.xlu0 %v821_v38 }
 0x3a7   :  { %943 = vperm.xlu1 %1475, %v1805_v36   ;;  %v734_v36 = vsel %vm688_vm1, %v1898_v43, -inf }
 0x3ab   :  { %908 = vperm.xlu1 %1475, %v1784_v28  }
 0x3b7   :  { %958 = vperm.xlu0 %1476, %v1898_v43  }
 0x3c2   :  { %v790_v49 = vpop.xlane.xlu0 %789 }
 0x3c3   :  { %1493 = vlog2.f32 %v790_v49 }
 0x3cd   :  { %v1494_v50 = vpop.eup %1493 }
 0x3ce   :  { %v836_v51 = vmul.f32 0.6931472, %v1494_v50 }
 0x3cf   :  { %735 = vmax.xlane.f32.xlu1 %v734_v36 }
 0x3d0   :  { %v866_v28 = vsub.f32 %v1832_v47, %v836_v51 }
 0x3d2   :  { %v962_v53 = vadd.f32 %v889_v63, %v866_v28  ;;  %v1919_v63 = vpop.permute.xlu1 %913 }
 0x3d4   :  { %978 = vst.msk [vmem:[#allocation2 + $0x8] sm:$0xff] %vm688_vm1, %v962_v53 }
 0x3d6   :  { %v709_v5 = vpop.xlane.xlu1 %708 }
 0x3d7   :  { %v1947_v32 = vsub.f32 %v1829_v45, %v709_v5 }
 0x3da   :  { %v924_v40 = vpop.permute.xlu1 %923 }
 0x3e0   :  { %953 = vperm.xlu1 %1475, %v1911_v39  }
 0x3ee   :  { %v724_v3 = vpop.xlane.xlu1 %723 }
 0x3ef   :  { %v1952_v33 = vsub.f32 %v1824_v44, %v724_v3 }
 0x3f1   :  { %v775_v38 = vmul.f32 1.442695, %v1952_v33 }
 0x3f2   :  { %v1922_v8 = vpop.permute.xlu1 %933 }
 0x3f7   :  { %v787_v55 = vpop.xlane.xlu0 %786 }
 0x3f8   :  { %1495 = vlog2.f32 %v787_v55 }
 0x3ff   :  { %v802_v0 = vpop.xlane.xlu0 %801 }
 0x400   :  { %1497 = vlog2.f32 %v802_v0 }
 0x402   :  { %v1496_v57 = vpop.eup %1495 }
 0x403   :  { %v834_v58 = vmul.f32 0.6931472, %v1496_v57 }
 0x404   :  { %732 = vmax.xlane.f32.xlu1 %v731_v60 }
 0x405   :  { %v865_v47 = vsub.f32 %v1841_v54, %v834_v58 }
 0x407   :  { %v961_v62 = vadd.f32 %v1839_v52, %v865_v47  ;;  %v1928_v52 = vsub.f32 %v1771_v23, %v1857_v2  ;;  %v1940_v2 = vsub.f32 %v1816_v41, %v712_v61 }
 0x409   :  { %977 = vst.msk [vmem:[#allocation2] sm:$0xff] %vm688_vm1, %v961_v62  ;;  %v759_v16 = vmul.f32 1.442695, %v1928_v52  ;;  %v767_v31 = vmul.f32 1.442695, %v1940_v2 }
 0x40a   :  { %v1498_v54 = vpop.eup %1497 }
 0x415   :  { %928 = vperm.xlu1 %1475, %v1790_v30   ;;  %v844_v30 = vmul.f32 0.6931472, %v1498_v54 }
 0x417   :  { %v870_v23 = vsub.f32 %v1849_v59, %v844_v30 }
 0x41e   :  { %v799_v6 = vpop.xlane.xlu0 %798 }
 0x41f   :  { %1499 = vlog2.f32 %v799_v6 }
 0x422   :  { %v1924_v10 = vpop.xlane.xlu0 %813 }
 0x423   :  { %v721_v12 = vpop.xlane.xlu1 %720 }
 0x424   :  { %v1957_v45 = vsub.f32 %v1855_v1, %v721_v12 }
 0x426   :  { %v811_v15 = vpop.xlane.xlu0 %810  ;;  %v773_v44 = vmul.f32 1.442695, %v1957_v45 }
 0x427   :  { %1501 = vlog2.f32 %v811_v15  ;;  %v944_v18 = vpop.permute.xlu1 %943 }
 0x428   :  { %1503 = vpow2.f32 %v759_v16 }
 0x429   :  { %v1500_v19 = vpop.eup %1499  ;;  %1505 = vpow2.f32 %v757_v21 }
 0x42a   :  { %v842_v22 = vmul.f32 0.6931472, %v1500_v19  ;;  %v1936_v24 = vpop.xlane.xlu0 %825 }
 0x42b   :  { %v909_v25 = vpop.permute.xlu1 %908 }
 0x42c   :  { %v869_v56 = vsub.f32 %v1869_v11, %v842_v22  ;;  %v966_v26 = vadd.f32 %v909_v25, %v870_v23  ;;  %v765_v11 = vmul.f32 1.442695, %v1947_v32 }
 0x42e   :  { %v965_v27 = vadd.f32 %v1863_v7, %v869_v56  ;;  %982 = vst.msk [vmem:[#allocation2 + $0x28] sm:$0xff] %vm688_vm1, %v966_v26  ;;  %v823_v29 = vpop.xlane.xlu0 %822 }
 0x42f   :  { %1507 = vlog2.f32 %v823_v29 }
 0x430   :  { %981 = vst.msk [vmem:[#allocation2 + $0x20] sm:$0xff] %vm688_vm1, %v965_v27  ;;  %1509 = vpow2.f32 %v767_v31 }
 0x431   :  { %v1502_v41 = vpop.eup %1501  ;;  %1511 = vpow2.f32 %v765_v11 }
 0x432   :  { %v850_v59 = vmul.f32 0.6931472, %v1502_v41  ;;  %v1504_v35 = vpop.eup %1503  ;;  %1513 = vpow2.f32 %v775_v38 }
 0x433   :  { %v1506_v49 = vpop.eup %1505  ;;  %v794_v50 = vsel %vm688_vm1, %v1504_v35, 0.0  ;;  %1515 = vpow2.f32 %v773_v44 }
 0x434   :  { %v873_v7 = vsub.f32 %v1873_v14, %v850_v59  ;;  %v791_v28 = vsel %vm688_vm1, %v1506_v49, 0.0 }
 0x436   :  { %v969_v37 = vadd.f32 %v924_v40, %v873_v7 }
 0x438   :  { %985 = vst.msk [vmem:[#allocation2 + $0x40] sm:$0xff] %vm688_vm1, %v969_v37 }
 0x439   :  { %v1508_v51 = vpop.eup %1507  ;;  %795 = vadd.xlane.f32.xlu1 %v794_v50 }
 0x43a   :  { %v858_v36 = vmul.f32 0.6931472, %v1508_v51  ;;  %v1510_v53 = vpop.eup %1509 }
 0x43b   :  { %v806_v1 = vsel %vm688_vm1, %v1510_v53, 0.0  ;;  %v1512_v57 = vpop.eup %1511 }
 0x43c   :  { %v877_v14 = vsub.f32 %v1882_v20, %v858_v36  ;;  %v803_v58 = vsel %vm688_vm1, %v1512_v57, 0.0  ;;  %v1514_v60 = vpop.eup %1513 }
 0x43d   :  { %792 = vadd.xlane.f32.xlu1 %v791_v28  ;;  %v818_v61 = vsel %vm688_vm1, %v1514_v60, 0.0  ;;  %v1516_v47 = vpop.eup %1515 }
 0x43e   :  { %v973_v55 = vadd.f32 %v944_v18, %v877_v14  ;;  %v815_v20 = vsel %vm688_vm1, %v1516_v47, 0.0 }
 0x440   :  { %989 = vst.msk [vmem:[#allocation2 + $0x60] sm:$0xff] %vm688_vm1, %v973_v55  ;;  %v959_v55 = vpop.permute.xlu0 %958 }
 0x441   :  { %807 = vadd.xlane.f32.xlu1 %v806_v1 }
 0x445   :  { %804 = vadd.xlane.f32.xlu1 %v803_v58 }
 0x449   :  { %819 = vadd.xlane.f32.xlu1 %v818_v61 }
 0x44d   :  { %816 = vadd.xlane.f32.xlu1 %v815_v20 }
 0x45c   :  { %v736_v62 = vpop.xlane.xlu1 %735 }
 0x45d   :  { %v1970_v5 = vsub.f32 %v1898_v43, %v736_v62 }
 0x45f   :  { %v783_v40 = vmul.f32 1.442695, %v1970_v5 }
 0x460   :  { %v1975_v54 = vpop.permute.xlu1 %953 }
 0x461   :  { %1517 = vpow2.f32 %v783_v40 }
 0x462   :  { %1519 = vlog2.f32 %v1924_v10 }
 0x46b   :  { %v1518_v0 = vpop.eup %1517 }
 0x46c   :  { %v830_v3 = vsel %vm688_vm1, %v1518_v0, 0.0  ;;  %v1520_v6 = vpop.eup %1519 }
 0x46d   :  { %831 = vadd.xlane.f32.xlu1 %v830_v3  ;;  %v852_v12 = vmul.f32 0.6931472, %v1520_v6 }
 0x46f   :  { %v874_v16 = vsub.f32 %v1866_v9, %v852_v12 }
 0x491   :  { %v733_v30 = vpop.xlane.xlu1 %732 }
 0x492   :  { %v1978_v15 = vsub.f32 %v1911_v39, %v733_v30 }
 0x494   :  { %v781_v43 = vmul.f32 1.442695, %v1978_v15 }
 0x495   :  { %v929_v18 = vpop.permute.xlu1 %928 }
 0x496   :  { %1521 = vpow2.f32 %v781_v43  ;;  %v970_v19 = vadd.f32 %v929_v18, %v874_v16 }
 0x498   :  { %986 = vst.msk [vmem:[#allocation2 + $0x48] sm:$0xff] %vm688_vm1, %v970_v19 }
 0x4a0   :  { %v1522_v21 = vpop.eup %1521 }
 0x4a1   :  { %v827_v10 = vsel %vm688_vm1, %v1522_v21, 0.0 }
 0x4a2   :  { %828 = vadd.xlane.f32.xlu1 %v827_v10 }
 0x4b3   :  { %948 = vperm.xlu1 %1475, %v1800_v34  }
 0x4c6   :  { %v796_v22 = vpop.xlane.xlu1 %795 }
 0x4c7   :  { %1523 = vlog2.f32 %v796_v22 }
 0x4ca   :  { %v793_v23 = vpop.xlane.xlu1 %792 }
 0x4cb   :  { %1525 = vlog2.f32 %v793_v23 }
 0x4ce   :  { %v808_v39 = vpop.xlane.xlu1 %807 }
 0x4cf   :  { %1527 = vlog2.f32 %v808_v39 }
 0x4d1   :  { %v1524_v25 = vpop.eup %1523 }
 0x4d2   :  { %v840_v56 = vmul.f32 0.6931472, %v1524_v25  ;;  %v805_v9 = vpop.xlane.xlu1 %804 }
 0x4d3   :  { %1529 = vlog2.f32 %v805_v9 }
 0x4d4   :  { %v868_v26 = vsub.f32 %v1928_v52, %v840_v56 }
 0x4d5   :  { %v1526_v27 = vpop.eup %1525 }
 0x4d6   :  { %v964_v29 = vadd.f32 %v1894_v42, %v868_v26  ;;  %v838_v31 = vmul.f32 0.6931472, %v1526_v27  ;;  %v820_v41 = vpop.xlane.xlu1 %819 }
 0x4d7   :  { %1531 = vlog2.f32 %v820_v41 }
 0x4d8   :  { %980 = vst.msk [vmem:[#allocation2 + $0x18] sm:$0xff] %vm688_vm1, %v964_v29  ;;  %v867_v34 = vsub.f32 %v1932_v13, %v838_v31 }
 0x4d9   :  { %v1528_v59 = vpop.eup %1527 }
 0x4da   :  { %v963_v11 = vadd.f32 %v1861_v4, %v867_v34  ;;  %v848_v7 = vmul.f32 0.6931472, %v1528_v59  ;;  %v817_v35 = vpop.xlane.xlu1 %816 }
 0x4db   :  { %1533 = vlog2.f32 %v817_v35 }
 0x4dc   :  { %979 = vst.msk [vmem:[#allocation2 + $0x10] sm:$0xff] %vm688_vm1, %v963_v11  ;;  %v872_v52 = vsub.f32 %v1940_v2, %v848_v7 }
 0x4dd   :  { %v1530_v37 = vpop.eup %1529 }
 0x4de   :  { %v968_v42 = vadd.f32 %v1901_v46, %v872_v52  ;;  %v846_v38 = vmul.f32 0.6931472, %v1530_v37 }
 0x4df   :  { %v1065_v47 = vld [vmem:[#allocation2 + $0x9] ss:$16 sm:$0x3]  ;;  %v1057_v20 = vld [vmem:[#allocation2 + $0x8] ss:$16 sm:$0x3] }
 0x4e0   :  { %984 = vst.msk [vmem:[#allocation2 + $0x38] sm:$0xff] %vm688_vm1, %v968_v42  ;;  %v871_v49 = vsub.f32 %v1947_v32, %v846_v38  ;;  %v1081_v12 = vld [vmem:[#allocation2 + $0xb] ss:$16 sm:$0x3] }
 0x4e1   :  { %v1532_v50 = vpop.eup %1531  ;;  %v1073_v30 = vld [vmem:[#allocation2 + $0xa] ss:$16 sm:$0x3] }
 0x4e2   :  { %v967_v13 = vadd.f32 %v1919_v63, %v871_v49  ;;  %v856_v51 = vmul.f32 0.6931472, %v1532_v50 }
 0x4e3   :  { %v1001_v11 = vld [vmem:[#allocation2 + $0x1] ss:$16 sm:$0x3]  ;;  %v1009_v7 = vld [vmem:[#allocation2 + $0x2] ss:$16 sm:$0x3] }
 0x4e4   :  { %983 = vst.msk [vmem:[#allocation2 + $0x30] sm:$0xff] %vm688_vm1, %v967_v13  ;;  %v876_v4 = vsub.f32 %v1952_v33, %v856_v51  ;;  %v1017_v42 = vld [vmem:[#allocation2 + $0x3] ss:$16 sm:$0x3] }
 0x4e5   :  { %v1534_v36 = vpop.eup %1533  ;;  %v1025_v49 = vld [vmem:[#allocation2 + $0x4] ss:$16 sm:$0x3] }
 0x4e6   :  { %v972_v44 = vadd.f32 %v1903_v48, %v876_v4  ;;  %v854_v2 = vmul.f32 0.6931472, %v1534_v36 }
 0x4e7   :  { %v1066_v60 = vld [vmem:[#allocation2 + $0x9] ss:$16 sm:$0xc]  ;;  %v1058_v61 = vld [vmem:[#allocation2 + $0x8] ss:$16 sm:$0xc] }
 0x4e8   :  { %988 = vst.msk [vmem:[#allocation2 + $0x58] sm:$0xff] %vm688_vm1, %v972_v44  ;;  %v875_v46 = vsub.f32 %v1957_v45, %v854_v2  ;;  %v1067_v0 = vor.u32 %v1066_v60, %v1065_v47  ;;  %v1059_v3 = vor.u32 %v1058_v61, %v1057_v20  ;;  %v1074_v43 = vld [vmem:[#allocation2 + $0xa] ss:$16 sm:$0xc] }
 0x4e9   :  { %v1075_v56 = vor.u32 %v1074_v43, %v1073_v30 }
 0x4ea   :  { %v971_v14 = vadd.f32 %v1922_v8, %v875_v46 }
 0x4eb   :  { %v1002_v34 = vld [vmem:[#allocation2 + $0x1] ss:$16 sm:$0xc]  ;;  %v1010_v59 = vld [vmem:[#allocation2 + $0x2] ss:$16 sm:$0xc] }
 0x4ec   :  { %987 = vst.msk [vmem:[#allocation2 + $0x50] sm:$0xff] %vm688_vm1, %v971_v14  ;;  %v1003_v52 = vor.u32 %v1002_v34, %v1001_v11  ;;  %v1011_v37 = vor.u32 %v1010_v59, %v1009_v7  ;;  %v1018_v38 = vld [vmem:[#allocation2 + $0x3] ss:$16 sm:$0xc] }
 0x4ed   :  { %v1026_v50 = vld [vmem:[#allocation2 + $0x4] ss:$16 sm:$0xc]  ;;  %v1114_v34 = vld [vmem:[#allocation2 + $0xf] ss:$16 sm:$0xc] }
 0x4ef   :  { %v1068_v62 = vld [vmem:[#allocation2 + $0x9] ss:$16 sm:$0x30]  ;;  %v1084_v18 = vld [vmem:[#allocation2 + $0xb] ss:$16 sm:$0x30] }
 0x4f0   :  { %v1069_v16 = vor.u32 %v1068_v62, %v1067_v0  ;;  %v1076_v19 = vld [vmem:[#allocation2 + $0xa] ss:$16 sm:$0x30]  ;;  %v1050_v62 = vld [vmem:[#allocation2 + $0x7] ss:$16 sm:$0xc] }
 0x4f1   :  { %v1077_v31 = vor.u32 %v1076_v19, %v1075_v56  ;;  %v1092_v43 = vld [vmem:[#allocation2 + $0xc] ss:$16 sm:$0x30]  ;;  %v1097_v56 = vld [vmem:[#allocation2 + $0xd] ss:$16 sm:$0x3] }
 0x4f3   :  { %v1012_v35 = vld [vmem:[#allocation2 + $0x2] ss:$16 sm:$0x30]  ;;  %v1020_v4 = vld [vmem:[#allocation2 + $0x3] ss:$16 sm:$0x30] }
 0x4f4   :  { %v1013_v51 = vor.u32 %v1012_v35, %v1011_v37  ;;  %v1028_v36 = vld [vmem:[#allocation2 + $0x4] ss:$16 sm:$0x30]  ;;  %v1052_v30 = vld [vmem:[#allocation2 + $0x7] ss:$16 sm:$0x30] }
 0x4f5   :  { %v1113_v35 = vld [vmem:[#allocation2 + $0xf] ss:$16 sm:$0x3] }
 0x4fa   :  { %v832_v32 = vpop.xlane.xlu1 %831 }
 0x4fb   :  { %1535 = vlog2.f32 %v832_v32  ;;  %v1019_v32 = vor.u32 %v1018_v38, %v1017_v42  ;;  %v1115_v38 = vor.u32 %v1114_v34, %v1113_v35 }
 0x4fc   :  { %1537 = vlog2.f32 %v1936_v24  ;;  %v1082_v24 = vld [vmem:[#allocation2 + $0xb] ss:$16 sm:$0xc] }
 0x4fd   :  { %v1083_v25 = vor.u32 %v1082_v24, %v1081_v12  ;;  %v1089_v12 = vld [vmem:[#allocation2 + $0xc] ss:$16 sm:$0x3] }
 0x4ff   :  { %v1085_v29 = vor.u32 %v1084_v18, %v1083_v25 }
 0x505   :  { %v1536_v63 = vpop.eup %1535 }
 0x506   :  { %v864_v28 = vmul.f32 0.6931472, %v1536_v63  ;;  %v1538_v48 = vpop.eup %1537  ;;  %v1027_v63 = vor.u32 %v1026_v50, %v1025_v49 }
 0x507   :  { %v860_v1 = vmul.f32 0.6931472, %v1538_v48  ;;  %v1021_v48 = vor.u32 %v1020_v4, %v1019_v32 }
 0x508   :  { %v880_v53 = vsub.f32 %v1970_v5, %v864_v28  ;;  %v1060_v5 = vld [vmem:[#allocation2 + $0x8] ss:$16 sm:$0x30]  ;;  %v1034_v28 = vld [vmem:[#allocation2 + $0x5] ss:$16 sm:$0xc] }
 0x509   :  { %v878_v8 = vsub.f32 %v1878_v17, %v860_v1  ;;  %v1061_v17 = vor.u32 %v1060_v5, %v1059_v3  ;;  %v1029_v1 = vor.u32 %v1028_v36, %v1027_v63  ;;  %v1090_v5 = vld [vmem:[#allocation2 + $0xc] ss:$16 sm:$0xc]  ;;  %v994_v36 = vld [vmem:[#allocation2] ss:$16 sm:$0xc] }
 0x50a   :  { %v976_v33 = vadd.f32 %v959_v55, %v880_v53  ;;  %v1042_v53 = vld [vmem:[#allocation2 + $0x6] ss:$16 sm:$0xc]  ;;  %v1091_v19 = vor.u32 %v1090_v5, %v1089_v12 }
 0x50c   :  { %992 = vst.msk [vmem:[#allocation2 + $0x78] sm:$0xff] %vm688_vm1, %v976_v33  ;;  %v1093_v25 = vor.u32 %v1092_v43, %v1091_v19 }
 0x52f   :  { %v829_v57 = vpop.xlane.xlu1 %828 }
 0x530   :  { %1539 = vlog2.f32 %v829_v57  ;;  %v1033_v57 = vld [vmem:[#allocation2 + $0x5] ss:$16 sm:$0x3] }
 0x531   :  { %v1035_v47 = vor.u32 %v1034_v28, %v1033_v57 }
 0x533   :  { %v949_v45 = vpop.permute.xlu1 %948 }
 0x534   :  { %v974_v58 = vadd.f32 %v949_v45, %v878_v8  ;;  %v1041_v8 = vld [vmem:[#allocation2 + $0x6] ss:$16 sm:$0x3]  ;;  %v1036_v45 = vld [vmem:[#allocation2 + $0x5] ss:$16 sm:$0x30] }
 0x535   :  { %v1043_v20 = vor.u32 %v1042_v53, %v1041_v8  ;;  %v1037_v3 = vor.u32 %v1036_v45, %v1035_v47 }
 0x536   :  { %990 = vst.msk [vmem:[#allocation2 + $0x68] sm:$0xff] %vm688_vm1, %v974_v58  ;;  %v1044_v58 = vld [vmem:[#allocation2 + $0x6] ss:$16 sm:$0x30] }
 0x537   :  { %v1045_v24 = vor.u32 %v1044_v58, %v1043_v20 }
 0x53a   :  { %v1540_v40 = vpop.eup %1539 }
 0x53b   :  { %v862_v6 = vmul.f32 0.6931472, %v1540_v40 }
 0x53d   :  { %v879_v21 = vsub.f32 %v1978_v15, %v862_v6  ;;  %v1070_v10 = vld [vmem:[#allocation2 + $0x9] ss:$16 sm:$0xc0]  ;;  %v1062_v22 = vld [vmem:[#allocation2 + $0x8] ss:$16 sm:$0xc0] }
 0x53e   :  { %v1071_v23 = vor.u32 %v1070_v10, %v1069_v16  ;;  %v1063_v39 = vor.u32 %v1062_v22, %v1061_v17  ;;  %v1086_v26 = vld [vmem:[#allocation2 + $0xb] ss:$16 sm:$0xc0]  ;;  %v1078_v27 = vld [vmem:[#allocation2 + $0xa] ss:$16 sm:$0xc0] }
 0x53f   :  { %v975_v9 = vadd.f32 %v1975_v54, %v879_v21  ;;  %v1087_v41 = vor.u32 %v1086_v26, %v1085_v29  ;;  %v1079_v15 = vor.u32 %v1078_v27, %v1077_v31  ;;  %v1004_v54 = vld [vmem:[#allocation2 + $0x1] ss:$16 sm:$0x30]  ;;  %v1049_v6 = vld [vmem:[#allocation2 + $0x7] ss:$16 sm:$0x3] }
 0x540   :  { %1153 = vrot.lane.b32.xlu1 %v1071_v23, %s1566_s6  ;;  %1149 = vrot.lane.b32.xlu0 %v1063_v39, %s1567_s9  ;;  %v1005_v13 = vor.u32 %v1004_v54, %v1003_v52  ;;  %v1051_v18 = vor.u32 %v1050_v62, %v1049_v6  ;;  %v1098_v21 = vld [vmem:[#allocation2 + $0xd] ss:$16 sm:$0xc]  ;;  %v1106_v10 = vld [vmem:[#allocation2 + $0xe] ss:$16 sm:$0xc] }
 0x541   :  { %991 = vst.msk [vmem:[#allocation2 + $0x70] sm:$0xff] %vm688_vm1, %v975_v9  ;;  %v1094_v23 = vld [vmem:[#allocation2 + $0xc] ss:$16 sm:$0xc0] }
 0x542   :  { %v1053_v39 = vor.u32 %v1052_v30, %v1051_v18  ;;  %v1105_v9 = vld [vmem:[#allocation2 + $0xe] ss:$16 sm:$0x3]  ;;  %v1100_v26 = vld [vmem:[#allocation2 + $0xd] ss:$16 sm:$0x30]  ;;  %v1095_v31 = vor.u32 %v1094_v23, %v1093_v25 }
 0x543   :  { %v1108_v27 = vld [vmem:[#allocation2 + $0xe] ss:$16 sm:$0x30]  ;;  %v1102_v59 = vld [vmem:[#allocation2 + $0xd] ss:$16 sm:$0xc0] }
 0x544   :  { %1161 = vrot.lane.b32.xlu1 %v1087_v41, %s1568_s10  ;;  %1157 = vrot.lane.b32.xlu0 %v1079_v15, %s1569_s11  ;;  %v1099_v41 = vor.u32 %v1098_v21, %v1097_v56  ;;  %v1107_v15 = vor.u32 %v1106_v10, %v1105_v9  ;;  %v1110_v11 = vld [vmem:[#allocation2 + $0xe] ss:$16 sm:$0xc0]  ;;  %v1116_v52 = vld [vmem:[#allocation2 + $0xf] ss:$16 sm:$0x30] }
 0x545   :  { %v1118_v49 = vld [vmem:[#allocation2 + $0xf] ss:$16 sm:$0xc0]  ;;  %v1117_v50 = vor.u32 %v1116_v52, %v1115_v38 }
 0x546   :  { %v1101_v7 = vor.u32 %v1100_v26, %v1099_v41  ;;  %v1109_v54 = vor.u32 %v1108_v27, %v1107_v15 }
 0x548   :  { %v1006_v44 = vld [vmem:[#allocation2 + $0x1] ss:$16 sm:$0xc0]  ;;  %v1014_v2 = vld [vmem:[#allocation2 + $0x2] ss:$16 sm:$0xc0]  ;;  %v1103_v37 = vor.u32 %v1102_v59, %v1101_v7  ;;  %v1111_v42 = vor.u32 %v1110_v11, %v1109_v54 }
 0x549   :  { %v1007_v46 = vor.u32 %v1006_v44, %v1005_v13  ;;  %v1015_v14 = vor.u32 %v1014_v2, %v1013_v51  ;;  %v1022_v55 = vld [vmem:[#allocation2 + $0x3] ss:$16 sm:$0xc0]  ;;  %v1030_v33 = vld [vmem:[#allocation2 + $0x4] ss:$16 sm:$0xc0]  ;;  %v1119_v13 = vor.u32 %v1118_v49, %v1117_v50 }
 0x54a   :  { %v1023_v60 = vor.u32 %v1022_v55, %v1021_v48  ;;  %v1031_v61 = vor.u32 %v1030_v33, %v1029_v1  ;;  %v1038_v40 = vld [vmem:[#allocation2 + $0x5] ss:$16 sm:$0xc0]  ;;  %v1046_v0 = vld [vmem:[#allocation2 + $0x6] ss:$16 sm:$0xc0] }
 0x54b   :  { %1121 = vrot.lane.b32.xlu1 %v1007_v46, %s1570_s12  ;;  %1125 = vrot.lane.b32.xlu0 %v1015_v14, %s1571_s1  ;;  %v1039_v16 = vor.u32 %v1038_v40, %v1037_v3  ;;  %v1047_v17 = vor.u32 %v1046_v0, %v1045_v24  ;;  %v1054_v22 = vld [vmem:[#allocation2 + $0x7] ss:$16 sm:$0xc0]  ;;  %v993_v44 = vld [vmem:[#allocation2] ss:$16 sm:$0x3] }
 0x54c   :  { %v1055_v29 = vor.u32 %v1054_v22, %v1053_v39  ;;  %v996_v2 = vld [vmem:[#allocation2] ss:$16 sm:$0x30]  ;;  %v995_v46 = vor.u32 %v994_v36, %v993_v44 }
 0x54d   :  { %v998_v63 = vld [vmem:[#allocation2] ss:$16 sm:$0xc0] }
 0x54e   :  { %v997_v28 = vor.u32 %v996_v2, %v995_v46 }
 0x54f   :  { %1129 = vrot.lane.b32.xlu1 %v1023_v60, %s1572_s13  ;;  %1133 = vrot.lane.b32.xlu0 %v1031_v61, %s1573_s14 }
 0x550   :  { %v999_v53 = vor.u32 %v998_v63, %v997_v28 }
 0x553   :  { %1137 = vrot.lane.b32.xlu1 %v1039_v16, %s1574_s15  ;;  %1141 = vrot.lane.b32.xlu0 %v1047_v17, %s1575_s16 }
 0x557   :  { %1145 = vrot.lane.b32.xlu1 %v1055_v29, %s1576_s17  ;;  %1165 = vrot.lane.b32.xlu0 %v1095_v31, %s1577_s18 }
 0x55b   :  { %1169 = vrot.lane.b32.xlu1 %v1103_v37, %s1578_s19  ;;  %1173 = vrot.lane.b32.xlu0 %v1111_v42, %s1579_s20 }
 0x55f   :  { %1177 = vrot.lane.b32.xlu1 %v1119_v13, %s1580_s21 }
 0x5b2   :  { %v1154_v51 = vpop.permute.xlu1 %1153  ;;  %v1150_v4 = vpop.permute.xlu0 %1149 }
 0x5b6   :  { %v1162_v14 = vpop.permute.xlu1 %1161  ;;  %v1158_v32 = vpop.permute.xlu0 %1157 }
 0x5bd   :  { %v1122_v55 = vpop.permute.xlu1 %1121  ;;  %v1126_v33 = vpop.permute.xlu0 %1125 }
 0x5be   :  { %v1180_v48 = vsel %vm688_vm1, %v999_v53, %v1122_v55 }
 0x5bf   :  { %v1182_v1 = vsel %vm1181_vm2, %v1180_v48, %v1126_v33 }
 0x5c1   :  { %v1130_v57 = vpop.permute.xlu1 %1129  ;;  %v1134_v8 = vpop.permute.xlu0 %1133 }
 0x5c2   :  { %v1184_v45 = vsel %vm1183_vm3, %v1182_v1, %v1130_v57 }
 0x5c3   :  { %v1185_v58 = vsel %vm54_vm0, %v1184_v45, %v1134_v8 }
 0x5c5   :  { %v1138_v60 = vpop.permute.xlu1 %1137  ;;  %v1142_v61 = vpop.permute.xlu0 %1141 }
 0x5c6   :  { %v1187_v47 = vsel %vm1186_vm4, %v1185_v58, %v1138_v60 }
 0x5c7   :  { %v1189_v20 = vsel %vm1188_vm5, %v1187_v47, %v1142_v61 }
 0x5c9   :  { %v1146_v62 = vpop.permute.xlu1 %1145  ;;  %v1166_v40 = vpop.permute.xlu0 %1165 }
 0x5ca   :  { %v1191_v5 = vsel %vm1190_vm6, %v1189_v20, %v1146_v62 }
 0x5cb   :  { %v1193_v0 = vsel %vm1192_vm7, %v1191_v5, %v1150_v4 }
 0x5cc   :  { %v1195_v3 = vsel %vm1194_vm8, %v1193_v0, %v1154_v51 }
 0x5cd   :  { %v1197_v24 = vsel %vm1196_vm9, %v1195_v3, %v1158_v32  ;;  %v1170_v6 = vpop.permute.xlu1 %1169  ;;  %v1174_v16 = vpop.permute.xlu0 %1173 }
 0x5ce   :  { %v1199_v12 = vsel %vm1198_vm10, %v1197_v24, %v1162_v14 }
 0x5cf   :  { %v1201_v30 = vsel %vm1200_vm11, %v1199_v12, %v1166_v40 }
 0x5d0   :  { %v1203_v43 = vsel %vm1202_vm12, %v1201_v30, %v1170_v6 }
 0x5d1   :  { %v1205_v17 = vsel %vm1204_vm13, %v1203_v43, %v1174_v16  ;;  %v1178_v18 = vpop.permute.xlu1 %1177 }
 0x5d2   :  { %v1207_v19 = vsel %vm1206_vm14, %v1205_v17, %v1178_v18 }
 0x5d3   :  { %1208 = vst [vmem:[#allocation3] sm:$0xff] %v1207_v19 }
 0x5d4   :  { %1552 = shalt.err (!%p1549_p4)
}
 0x5d5   :  { %s1553_s27 = scalar_lea.hbm %s2032_s7, 128 }
 0x5d6   :  { %p1554_p5 = scmp.ne.s32.totalorder %s2032_s7, %s1553_s27  ;;  %p1557_p6 = scmp.lt.u32.totalorder %s1553_s27, %s2032_s7 }
 0x5d8   :  { %p1559_p7 = pnand %p1557_p6, %p1554_p5 }
 0x5da   :  { %1562 = shalt.err (!%p1559_p7)
}
 0x5db   :  { %1218 = dma.vmem_to_hbm [thread:$0]  %s1216_s23, 128, %s2032_s7, [#allocation4]  }
 0x5dc   :  { %1563 = dma.done.wait [#allocation4], 128  }
 0x5dd   :  { %1564 = vsyncadd [#allocation4], 4294967168 }
 0x5de   :  { %1222 = vsyncpa [#allocation4], 1 }

// kernel: tpu_custom_call.1
= control target key start
LH: loop header
LB: loop body
LE: loop exit
PB: predicated region body
PF: predicated region fallthrough
CT: control target
= control target key end

     0   :  { %12 = vsyncpa [#allocation3], 0  ;;  %s831_s24 = smov 0   ;;  %s936_s0 = inlined_call_operand.vmem [shape: f32[16,32], index: 0, kind: input, shape index: {}]   ;;  %s937_s1 = inlined_call_operand.vmem [shape: f32[32,32], index: 1, kind: input, shape index: {}]   ;;  %s938_s2 = inlined_call_operand.vmem [shape: f32[1,32], index: 2, kind: input, shape index: {}]   ;;  %s939_s3 = inlined_call_operand.hbm [shape: f32[32,32], index: 3, kind: input, shape index: {}]   ;;  %s940_s4 = inlined_call_operand.vmem [shape: f32[1,32], index: 4, kind: input, shape index: {}]   ;;  %s941_s5 = inlined_call_operand.vmem [shape: f32[32,9], index: 5, kind: input, shape index: {}]   ;;  %s942_s6 = inlined_call_operand.vmem [shape: f32[1,9], index: 6, kind: input, shape index: {}]   ;;  %s943_s7 = inlined_call_operand.vmem [shape: f32[16,8], index: 7, kind: output, shape index: {}]  }
   0x1 LB: > { %s837_s25 = sadd.s32 4294967295, %s782_s24   ;;  %p632_p0 = scmp.ge.s32.totalorder %s782_s24, 1  ;;  %s782_s24 = sphi %s831_s24, %s18_s24  }
   0x2   : > { %p201_p1 = scmp.lt.s32.totalorder %s782_s24, 3  ;;  %s784_s26 = smov [#allocation2]  }
   0x3   : > { %s219_s27 = sshll.u32 %s784_s26, 4  ;;  %p944_p3 = scmp.eq.s32.totalorder %s837_s25, 0  ;;  %s220_s27 = int_to_ptr.vmem [resolvable:$true] %s219_s27 }
   0x4   : > { %p841_p2 = pnand %p632_p0, %p201_p1  ;;  %s744_s9 = scalar_lea.hbm %s939_s3, 512 }
   0x5   : > { %p745_p6 = scmp.ne.s32.totalorder %s939_s3, %s744_s9  ;;  %p751_p10 = scmp.lt.u32.totalorder %s744_s9, %s939_s3 }
   0x6   : > { %s946_s28 = scalar_select %p841_p2, 1, 0 }
   0x7   : > { %p717_p4 = pneg %p841_p2 }
   0x9   : > { %p850_p5 = pnand %p944_p3, %p717_p4 }
   0xb   : > { %p746_p7 = pneg %p850_p5 }
   0xd   : > { %p747_p8 = pnand %p746_p7, %p745_p6 }
   0xf   : > { %p748_p9 = pneg %p747_p8 }
  0x11   : > { %p753_p11 = pnand %p751_p10, %p748_p9 }
  0x13   : > { %756 = shalt.err (!%p753_p11)
}
  0x14   : > { %s757_s14 = scalar_lea.vmem %s220_s27, 512  ;;  %p765_p1 = scmp.lt.s32.totalorder %s220_s27, %s220_s27 }
  0x15   : > { %p758_p12 = scmp.ne.s32.totalorder %s220_s27, %s757_s14  ;;  %p766_p4 = scmp.lt.s32.totalorder %s757_s14, %s757_s14 }
  0x17   : > { %p760_p13 = pnand %p758_p12, %p746_p7  ;;  %p767_p3 = por %p766_p4, %p765_p1 }
  0x19   : > { %p761_p0 = pneg %p760_p13 }
  0x1b   : > { %p768_p2 = pnand %p767_p3, %p761_p0 }
  0x1d   : > { %771 = shalt.err (!%p768_p2)
}
  0x1e   : > { %s785_s15 = smov 128   ;;  %s786_s16 = smov 8  }
  0x1f   : > { %720 = dma.hbm_to_vmem [thread:$0]  (!%p850_p5), %s939_s3, 512, %s220_s27, [#allocation3], %s785_s15, %s785_s15, %s786_s16  }
  0x20   : > { %p948_p6 = scmp.ne.s32.totalorder %s946_s28, 0 }
  0x21   : > { %p949_p8 = scmp.eq.s32.totalorder (!%p948_p6), %s837_s25, 0 }
  0x22   : > { %251 = sbr.rel (%p948_p6) target bundleno = 1017 (0x3f9), region = 48 }
  0x29   : > { %777 = dma.done.wait (%p949_p8), [#allocation3], 512   ;;  %p950_p7 = pmov %p949_p8 }
  0x2a   : > { %p281_p2 = scmp.lt.s32.totalorder %s837_s25, 1  ;;  %v787_v0 = vmov 0.0|0.0   ;;  %vm788_vm0 = vmmov 0   ;;  %v789_v1 = vmov 0.0   ;;  %v290_v2 = vld [vmem:[%s937_s1] sm:$0xff]  ;;  %v291_v3 = vld [vmem:[%s937_s1 + $0x8] sm:$0xff] }
  0x2b   : > { %779 = vsyncadd (%p950_p7), [#allocation3], 4294966784  ;;  %695 = vmatprep.subr.bf16.mxu0 %v787_v0  ;;  %670 = vmatprep.mubr.msk.f32.mxu0 %vm788_vm0, %v789_v1  ;;  %v292_v4 = vld [vmem:[%s937_s1 + $0x10] sm:$0xff]  ;;  %v696_v5 = vpack.c.bf16 %v291_v3, %v290_v2  ;;  %v293_v6 = vld [vmem:[%s937_s1 + $0x18] sm:$0xff]  ;;  %vm301_vm1 = vcmask 261120   ;;  %v790_v31 = vmov 8  }
  0x2c   : > { %701 = vmatprep.subr.bf16.mxu1 %v787_v0  ;;  %681 = vmatprep.mubr.msk.f32.mxu1 %vm788_vm0, %v789_v1  ;;  %s952_s25 = smov (!%p281_p2, %s837_s25), 1  ;;  %v376_v7 = vld [vmem:[#allocation2] sm:$0xff]  ;;  %v377_v8 = vld [vmem:[#allocation2 + $0x8] sm:$0xff]  ;;  %v699_v9 = vpack.c.bf16 %v293_v6, %v292_v4  ;;  %v378_v12 = vld [vmem:[#allocation2 + $0x10] sm:$0xff]  ;;  %vm545_vm2 = vcmask 64512  }
  0x2d   : > { %s637_s29 = sshll.u32 %s952_s25, 3  ;;  %697 = vmatpush3.bf16.msra.mxu0 %v696_v5  ;;  %v702_v10 = vpack.c.bf16 %v377_v8, %v376_v7  ;;  %v379_v13 = vld [vmem:[#allocation2 + $0x18] sm:$0xff]  ;;  %v461_v15 = vld [vmem:[%s941_s5] sm:$0xff]  ;;  %v462_v16 = vld [vmem:[%s941_s5 + $0x8] sm:$0xff]  ;;  %738 = vset.pattern.permute.xlu1 %v790_v31 }
  0x2e   : > { %698 = vmatprep.subr.bf16.mxu0 %v787_v0  ;;  %s284_s9 = scalar_lea.vmem %s936_s0, %s637_s29  ;;  %v705_v14 = vpack.c.bf16 %v379_v13, %v378_v12  ;;  %v708_v17 = vpack.c.bf16 %v462_v16, %v461_v15  ;;  %v639_v18 = vld [vmem:[%s938_s2] ss:$0 sm:$0xff]  ;;  %v463_v23 = vld [vmem:[%s941_s5 + $0x10] sm:$0xff]  ;;  %v464_v24 = vld [vmem:[%s941_s5 + $0x18] sm:$0xff]  ;;  %739 = vset.pattern.permute.xlu0 %v790_v31  ;;  %s288_s28 = scalar_lea.vmem %s943_s7, %s637_s29 }
  0x2f   : > { %703 = vmatpush3.bf16.msra.mxu1 %v702_v10  ;;  %v289_v11 = vld [vmem:[%s284_s9] sm:$0xff]  ;;  %v711_v25 = vpack.c.bf16 %v464_v24, %v463_v23 }
  0x30   : > { %704 = vmatprep.subr.bf16.mxu1 %v787_v0  ;;  %v641_v26 = vld [vmem:[%s940_s4] ss:$0 sm:$0xff] }
  0x31   : > { %700 = vmatpush3.bf16.msra.mxu0 %v699_v9  ;;  %v643_v32 = vld [vmem:[%s942_s6] ss:$0 sm:$0xff] }
  0x32   : > { %707 = vmatprep.subr.bf16.mxu0 %v787_v0 }
  0x33   : > { %706 = vmatpush3.bf16.msra.mxu1 %v705_v14 }
  0x34   : > { %671 = vmatmul.mubr.msk.f32.vlgmr.msra.gmra.mrb[0].mxu0 %vm301_vm1, %v289_v11 }
  0x35   : > { %692 = vmatprep.mubr.msk.f32.mxu0 %vm788_vm0, %v789_v1  ;;  %709 = vmatpush3.bf16.msra.mxu0 %v708_v17 }
  0x36   : > { %710 = vmatprep.subr.bf16.mxu0 %v787_v0 }
  0x39   : > { %712 = vmatpush3.bf16.msra.mxu0 %v711_v25 }
 0x107   : > { %v371_v19 = vpop.f32.mrb[0].mxu0 }
 0x108   : > { %v372_v20 = vadd.f32 %v639_v18, %v371_v19  ;;  %v672_v21 = vpop.f32.mrb[1].mxu0 }
 0x10a   : > { %v375_v22 = vmax.f32 %v372_v20, 0.0 }
 0x10c   : > { %682 = vmatmul.mubr.msk.f32.vlgmr.msra.gmra.mrb[0].mxu1 %vm301_vm1, %v375_v22 }
 0x1df   : > { %v456_v27 = vpop.f32.mrb[0].mxu1 }
 0x1e0   : > { %v457_v28 = vadd.f32 %v641_v26, %v456_v27  ;;  %v683_v29 = vpop.f32.mrb[1].mxu1 }
 0x1e2   : > { %v460_v30 = vmax.f32 %v457_v28, 0.0 }
 0x1e4   : > { %693 = vmatmul.mubr.msk.f32.vlgmr.msra.gmra.mrb[2].mxu0 %vm301_vm1, %v460_v30 }
 0x2b7   : > { %v541_v33 = vpop.f32.mrb[2].mxu0 }
 0x2b8   : > { %v542_v34 = vadd.f32 %v643_v32, %v541_v33  ;;  %v694_v35 = vpop.f32.mrb[3].mxu0 }
 0x2ba   : > { %560 = vperm.xlu1 %738, %v542_v34   ;;  %v546_v36 = vsel %vm545_vm2, %v542_v34, -inf }
 0x2bb   : > { %547 = vmax.xlane.f32.xlu0 %v546_v36 }
 0x339   : > { %v561_v46 = vpop.permute.xlu1 %560 }
 0x348   : > { %v548_v37 = vpop.xlane.xlu0 %547 }
 0x349   : > { %v549_v38 = vsub.f32 %v542_v34, %v548_v37 }
 0x34b   : > { %v550_v39 = vmul.f32 1.442695, %v549_v38 }
 0x34d   : > { %740 = vpow2.f32 %v550_v39 }
 0x357   : > { %v741_v40 = vpop.eup %740 }
 0x358   : > { %v552_v41 = vsel %vm545_vm2, %v741_v40, 0.0 }
 0x359   : > { %553 = vadd.xlane.f32.xlu0 %v552_v41 }
 0x3e6   : > { %v554_v42 = vpop.xlane.xlu0 %553 }
 0x3e7   : > { %742 = vlog2.f32 %v554_v42 }
 0x3f1   : > { %v743_v43 = vpop.eup %742 }
 0x3f2   : > { %v556_v44 = vmul.f32 0.6931472, %v743_v43 }
 0x3f4   : > { %v557_v45 = vsub.f32 %v549_v38, %v556_v44 }
 0x3f6   : > { %v563_v47 = vadd.f32 %v561_v46, %v557_v45 }
 0x3f8   : > { %564 = vst.msk [vmem:[%s288_s28] sm:$0xff] %vm545_vm2, %v563_v47 }
 0x3f9 PF: > { %s18_s24 = sadd.s32 1, %s782_s24  }
 0x3fa   : > { %p15_p3 = scmp.ge.s32.totalorder %s18_s24, 4  }
 0x3fc   :  { %17 = sbr.rel (!%p15_p3) target bundleno = 1 (0x1), region = 83 }
 0x403   :  { %584 = vsyncpa [#allocation3], 1 }
 0x404   :  { %586 = vsyncpa [#allocation3 + $0x1], 1 }

</bundles_post_ra>
